<compile_context>
chip_gen: v7x
topology: tpu7x:2x2x1
jax: 0.10.0
libtpu: 0.0.40
codegen_flags: <defaults>
</compile_context>

<pallas_src>
import math

import jax
import jax.numpy as jnp
from jax.experimental import pallas as pl
from jax.experimental.pallas import tpu as pltpu


def _round_up(x, m):
    return (x + m - 1) // m * m


def _leaky(x, slope=0.01):
    return jnp.where(x >= 0, x, slope * x)


def double_conv11_forward(x_nchw, params, f_size, p_size, stride=2):
    assert stride == 2, "module hard-codes stride=2"
    # TODO(synk): PyTorch 'same' padding for even f_size is asymmetric; only odd f_size handled.
    assert f_size % 2 == 1
    w1, b1, w2, b2, w3, b3 = params                     # OIHW weights, (O,) biases
    n, cin, h, w = x_nchw.shape
    cout = w1.shape[0]
    f = f_size
    p2 = (f - 1) // 2                                   # 'same' padding of conv2/3
    cpad = _round_up(max(cout, 128), 128)               # lane-dense channel dim

    # output spatial dims of the stride-2 conv (PyTorch formula)
    hp, wp = h + 2 * p_size, w + 2 * p_size
    ho = (hp - f) // 2 + 1
    wo = (wp - f) // 2 + 1
    hw = ho * wo

    # ---- images per grid step: fill the MXU M dimension, but keep >=2 grid
    # steps (v7x megacore) when that still leaves M >= one 128-row MXU tile. --
    nb = max(1, min(n, (256 + hw - 1) // hw))
    while nb > 1 and -(-n // nb) < 2 and (nb // 2) * hw >= 128:
        nb //= 2
    n_pad = _round_up(n, nb)
    m_rows = nb * hw

    # ---- glue: NHWC + zero-pad + space-to-depth (same element count as input)
    x = jnp.transpose(x_nchw, (0, 2, 3, 1)).astype(jnp.float32)
    hp_e, wp_e = hp + (hp % 2), wp + (wp % 2)           # even extents for s2d
    xp = jnp.pad(x, ((0, n_pad - n),
                     (p_size, p_size + (hp_e - hp)),
                     (p_size, p_size + (wp_e - wp)),
                     (0, 0)))
    hs, ws = hp_e // 2, wp_e // 2
    x_sd = xp.reshape(n_pad, hs, 2, ws, 2, cin).transpose(0, 1, 3, 2, 4, 5)
    x_sd = x_sd.reshape(n_pad, hs, ws, 4 * cin)         # channel = (ph*2+pw)*cin + c

    # ---- weight packing (wrapper-side, one-time, bf16 MXU operands) --------
    # conv1: per s2d spatial offset (dh, dw) a (4*cin, cpad) weight whose row
    # (ph*2+pw)*cin + c is w1[o, c, 2*dh+ph, 2*dw+pw] (zero if tap is OOB).
    nd = p2 + 1
    w1h = jnp.transpose(w1, (2, 3, 1, 0)).astype(jnp.float32)     # HWIO
    w1sd = jnp.zeros((nd, nd, 4 * cin, cpad), jnp.float32)
    for kh in range(f):
        for kw in range(f):
            dh, ph = kh // 2, kh % 2
            dw, pw = kw // 2, kw % 2
            base = (ph * 2 + pw) * cin
            w1sd = w1sd.at[dh, dw, base:base + cin, :cout].set(w1h[kh, kw])
    w1sd = w1sd.astype(jnp.bfloat16)

    def pad_hwio(wgt):                                  # OIHW -> (f, f, cpad, cpad) bf16
        wh = jnp.transpose(wgt, (2, 3, 1, 0)).astype(jnp.float32)
        wh = jnp.pad(wh, ((0, 0), (0, 0), (0, cpad - cout), (0, cpad - cout)))
        return wh.astype(jnp.bfloat16)

    w2p, w3p = pad_hwio(w2), pad_hwio(w3)

    def pad_bias(b):
        return jnp.pad(b.astype(jnp.float32), (0, cpad - cout)).reshape(1, cpad)

    b1p, b2p, b3p = pad_bias(b1), pad_bias(b2), pad_bias(b3)

    # 'same'-padding scratch layout: interior starts at sublane-aligned column
    # c0 so the interior write is an unmasked aligned store; tap reads are
    # ref-side slices at column c0 - p2 + kw (offset folded into the vld).
    hp2 = ho + 2 * p2
    c0 = _round_up(p2, 8)
    wpad = _round_up(c0 + wo + p2, 8)

    # TODO(synk): merge conv1's nd^2 taps into one K=nd^2*4*cin matmul via an
    # in-kernel lane-dim concat once minor-dim concatenate support is confirmed
    # on all targets (minor at cin=4; conv1 is dwarfed by conv2/3).
    # TODO(synk): single-buffer the constant weight/bias blocks
    # (pipeline_mode=pl.Buffered(1)) to halve their VMEM for the v7x 64 MiB
    # budget once the larger-image spatial-tiled variant lands.
    # TODO(synk): if cout stays tiny, pack several images' real channels into
    # the 128-lane dim instead of zero-padding one image's channels to 128.
    # TODO(synk): for scaled-up hw add a spatial grid axis (p2 halo) and move
    # the accumulator into an f32 VMEM scratch / fori_loop(unroll=True) so the
    # tap loop doesn't flip into a spill-bound regime.

    def kernel(x_ref, w1_ref, b1_ref, w2_ref, b2_ref, w3_ref, b3_ref,
               o_ref, pad_ref):
        # ---- conv1 (stride 2 via space-to-depth) + LeakyReLU ----
        acc = jnp.zeros((m_rows, cpad), jnp.float32)
        for dh in range(nd):
            for dw in range(nd):
                win = (x_ref[:, dh:dh + ho, dw:dw + wo, :]
                       .reshape(m_rows, 4 * cin).astype(jnp.bfloat16))
                acc = acc + jnp.dot(win, w1_ref[dh, dw],
                                    preferred_element_type=jnp.float32)
        act = _leaky(acc + b1_ref[...])                 # (m_rows, cpad), f32

        # ---- zero only the halo ring of the 'same'-padding scratch ----
        if p2 > 0:
            zrow = jnp.zeros((nb, p2, wo + 2 * p2, cpad), jnp.float32)
            pad_ref[:, 0:p2, c0 - p2:c0 + wo + p2, :] = zrow
            pad_ref[:, p2 + ho:hp2, c0 - p2:c0 + wo + p2, :] = zrow
            zcol = jnp.zeros((nb, ho, p2, cpad), jnp.float32)
            pad_ref[:, p2:p2 + ho, c0 - p2:c0, :] = zcol
            pad_ref[:, p2:p2 + ho, c0 + wo:c0 + wo + p2, :] = zcol

        # ---- conv2 / conv3 ('same', stride 1) + LeakyReLU ----
        for w_ref, b_ref in ((w2_ref, b2_ref), (w3_ref, b3_ref)):
            pad_ref[:, p2:p2 + ho, c0:c0 + wo, :] = act.reshape(nb, ho, wo, cpad)
            acc = jnp.zeros((m_rows, cpad), jnp.float32)
            for kh in range(f):
                for kw in range(f):
                    cc = c0 - p2 + kw
                    win = (pad_ref[:, kh:kh + ho, cc:cc + wo, :]
                           .reshape(m_rows, cpad).astype(jnp.bfloat16))
                    acc = acc + jnp.dot(win, w_ref[kh, kw],
                                        preferred_element_type=jnp.float32)
            act = _leaky(acc + b_ref[...])

        o_ref[...] = act.reshape(nb, hw, cpad).astype(o_ref.dtype)  # full-lane stores

    flops_per_img = 2 * hw * f * f * cout * (cin + 2 * cout)
    bytes_accessed = (4 * int(x_sd.size) + 2 * int(w1sd.size)
                      + 2 * (int(w2p.size) + int(w3p.size))
                      + 4 * 3 * cpad + 4 * n_pad * hw * cpad)

    # right-sized VMEM request: double-buffered blocks + scratch, 2x headroom.
    vmem_need = (2 * (nb * hs * ws * 4 * cin * 4          # x block (f32)
                      + nd * nd * 4 * cin * cpad * 2      # w1 (bf16)
                      + 2 * f * f * cpad * cpad * 2       # w2 + w3 (bf16)
                      + 3 * cpad * 4                      # biases (f32)
                      + m_rows * cpad * 4)                # out block (f32)
                 + nb * hp2 * wpad * cpad * 4)            # halo scratch (f32)
    vmem_limit = int(min(64 << 20, max(8 << 20, 2 * vmem_need)))

    out_slab = pl.pallas_call(
        kernel,
        out_shape=jax.ShapeDtypeStruct((n_pad, hw, cpad), jnp.float32),
        grid_spec=pltpu.PrefetchScalarGridSpec(
            num_scalar_prefetch=0,
            grid=(n_pad // nb,),
            in_specs=[
                pl.BlockSpec((nb, hs, ws, 4 * cin), lambda i: (i, 0, 0, 0)),
                pl.BlockSpec((nd, nd, 4 * cin, cpad), lambda i: (0, 0, 0, 0)),
                pl.BlockSpec((1, cpad), lambda i: (0, 0)),
                pl.BlockSpec((f, f, cpad, cpad), lambda i: (0, 0, 0, 0)),
                pl.BlockSpec((1, cpad), lambda i: (0, 0)),
                pl.BlockSpec((f, f, cpad, cpad), lambda i: (0, 0, 0, 0)),
                pl.BlockSpec((1, cpad), lambda i: (0, 0)),
            ],
            out_specs=pl.BlockSpec((nb, hw, cpad), lambda i: (i, 0, 0)),
            scratch_shapes=[pltpu.VMEM((nb, hp2, wpad, cpad), jnp.float32)],
        ),
        compiler_params=pltpu.CompilerParams(
            dimension_semantics=("parallel",),
            vmem_limit_bytes=vmem_limit,
        ),
        cost_estimate=pl.CostEstimate(
            flops=n_pad * flops_per_img,
            transcendentals=0,
            bytes_accessed=int(bytes_accessed),
        ),
    )(x_sd, w1sd, b1p, w2p, b2p, w3p, b3p)

    out_nhwc = out_slab[:n, :, :cout].reshape(n, ho, wo, cout)
    return jnp.transpose(out_nhwc, (0, 3, 1, 2))        # back to NCHW


def init_params(key, in_channels, out_channels, f_size):
    """Deterministic PyTorch-Conv2d-style uniform init (synthetic weights)."""
    ks = jax.random.split(key, 6)

    def conv_init(kw_key, kb_key, cin, cout, f):
        bound = 1.0 / math.sqrt(cin * f * f)
        w = jax.random.uniform(kw_key, (cout, cin, f, f), jnp.float32, -bound, bound)
        b = jax.random.uniform(kb_key, (cout,), jnp.float32, -bound, bound)
        return w, b

    w1, b1 = conv_init(ks[0], ks[1], in_channels, out_channels, f_size)
    w2, b2 = conv_init(ks[2], ks[3], out_channels, out_channels, f_size)
    w3, b3 = conv_init(ks[4], ks[5], out_channels, out_channels, f_size)
    return (w1, b1, w2, b2, w3, b3)


def reference_forward(x, params, f, p, mxu_dtype=jnp.float32):
    """Pure-JAX (XLA conv) reference of the PyTorch forward, NCHW.
    mxu_dtype=bfloat16 mirrors the kernel's bf16-operand / f32-accum matmuls."""
    w1, b1, w2, b2, w3, b3 = params
    dn = ('NCHW', 'OIHW', 'NCHW')

    def lrelu(y):
        return jnp.where(y >= 0, y, 0.01 * y)

    def conv(inp, wgt, strides, pad):
        return jax.lax.conv_general_dilated(
            inp.astype(mxu_dtype), wgt.astype(mxu_dtype), strides, pad,
            dimension_numbers=dn, preferred_element_type=jnp.float32)

    p2 = (f - 1) // 2
    y = lrelu(conv(x, w1, (2, 2), [(p, p), (p, p)]) + b1[None, :, None, None])
    y = lrelu(conv(y, w2, (1, 1), [(p2, p2), (p2, p2)]) + b2[None, :, None, None])
    y = lrelu(conv(y, w3, (1, 1), [(p2, p2), (p2, p2)]) + b3[None, :, None, None])
    return y


if __name__ == "__main__":
    N, CIN, H, W = 2, 4, 16, 16
    COUT, F, P = 8, 3, 1

    key = jax.random.PRNGKey(0)
    kx, kp = jax.random.split(key)
    x = jax.random.normal(kx, (N, CIN, H, W), jnp.float32)
    params = init_params(kp, CIN, COUT, F)

    out = double_conv11_forward(x, params, F, P)
    out = jax.block_until_ready(out)

    ref_q = reference_forward(x, params, F, P, mxu_dtype=jnp.bfloat16)
    ref_f32 = reference_forward(x, params, F, P)
    assert out.shape == ref_f32.shape == (N, COUT, 8, 8), (out.shape, ref_f32.shape)
    # 1) kernel exactness vs an identically bf16-quantized conv reference
    if not bool(jnp.allclose(out, ref_q, atol=1e-3, rtol=1e-3)):
        raise AssertionError("Pallas kernel does not match bf16-quantized reference")
    # 2) bf16-operand rounding bound vs the full-f32 PyTorch semantics
    if not bool(jnp.allclose(out, ref_f32, atol=2e-2, rtol=2e-2)):
        raise AssertionError("Pallas kernel drifts too far from f32 reference")
    print("KERNEL_OK")
</pallas_src>

<mosaic_0001>
module attributes {stable_mosaic.version = 11 : i64} {
  func.func @kernel(%arg0: i32, %arg1: memref<2x9x9x16xf32, #tpu.memory_space<vmem>>, %arg2: memref<2x2x16x128xbf16, #tpu.memory_space<vmem>>, %arg3: memref<1x128xf32, #tpu.memory_space<vmem>>, %arg4: memref<3x3x128x128xbf16, #tpu.memory_space<vmem>>, %arg5: memref<1x128xf32, #tpu.memory_space<vmem>>, %arg6: memref<3x3x128x128xbf16, #tpu.memory_space<vmem>>, %arg7: memref<1x128xf32, #tpu.memory_space<vmem>>, %arg8: memref<2x64x128xf32, #tpu.memory_space<vmem>>, %arg9: memref<2x10x24x128xf32, #tpu.memory_space<vmem>>) attributes {dimension_semantics = [#tpu.dimension_semantics<parallel>], iteration_bounds = array<i64: 1>, scalar_prefetch = 0 : i64, scratch_operands = 1 : i64, tpu.core_type = #tpu.core_type<tc>, window_params = [{transform_indices = @transform_0, window_bounds = array<i64: 2, 9, 9, 16>}, {pipeline_mode = #tpu.pipeline_mode<synchronous>, transform_indices = @transform_1, window_bounds = array<i64: 2, 2, 16, 128>}, {pipeline_mode = #tpu.pipeline_mode<synchronous>, transform_indices = @transform_2, window_bounds = array<i64: 1, 128>}, {pipeline_mode = #tpu.pipeline_mode<synchronous>, transform_indices = @transform_3, window_bounds = array<i64: 3, 3, 128, 128>}, {pipeline_mode = #tpu.pipeline_mode<synchronous>, transform_indices = @transform_4, window_bounds = array<i64: 1, 128>}, {pipeline_mode = #tpu.pipeline_mode<synchronous>, transform_indices = @transform_5, window_bounds = array<i64: 3, 3, 128, 128>}, {pipeline_mode = #tpu.pipeline_mode<synchronous>, transform_indices = @transform_6, window_bounds = array<i64: 1, 128>}, {transform_indices = @transform_7, window_bounds = array<i64: 2, 64, 128>}]} {
    %cst = arith.constant 0.000000e+00 : f32
    %0 = vector.broadcast %cst : f32 to vector<128x128xf32>
    %c0 = arith.constant 0 : index
    %c0_0 = arith.constant 0 : index
    %c0_1 = arith.constant 0 : index
    %c0_2 = arith.constant 0 : index
    %1 = vector.load %arg1[%c0, %c0_0, %c0_1, %c0_2] : memref<2x9x9x16xf32, #tpu.memory_space<vmem>>, vector<2x8x8x16xf32>
    %2 = vector.shape_cast %1 : vector<2x8x8x16xf32> to vector<128x16xf32>
    %3 = arith.truncf %2 : vector<128x16xf32> to vector<128x16xbf16>
    %c0_3 = arith.constant 0 : index
    %c0_4 = arith.constant 0 : index
    %c0_5 = arith.constant 0 : index
    %c0_6 = arith.constant 0 : index
    %4 = vector.load %arg2[%c0_3, %c0_4, %c0_5, %c0_6] : memref<2x2x16x128xbf16, #tpu.memory_space<vmem>>, vector<1x1x16x128xbf16>
    %5 = vector.shape_cast %4 : vector<1x1x16x128xbf16> to vector<16x128xbf16>
    %cst_7 = arith.constant dense<0.000000e+00> : vector<128x128xf32>
    %6 = tpu.matmul %3, %5, %cst_7 {dimension_numbers = #tpu.dot_dimension_numbers<[1], [0], [0], [1], [0, 0, 1, 1], [], []>} : vector<128x16xbf16>, vector<16x128xbf16>, vector<128x128xf32> -> vector<128x128xf32>
    %7 = arith.addf %0, %6 : vector<128x128xf32>
    %c0_8 = arith.constant 0 : index
    %c0_9 = arith.constant 0 : index
    %c1 = arith.constant 1 : index
    %c0_10 = arith.constant 0 : index
    %8 = vector.load %arg1[%c0_8, %c0_9, %c1, %c0_10] : memref<2x9x9x16xf32, #tpu.memory_space<vmem>>, vector<2x8x8x16xf32>
    %9 = vector.shape_cast %8 : vector<2x8x8x16xf32> to vector<128x16xf32>
    %10 = arith.truncf %9 : vector<128x16xf32> to vector<128x16xbf16>
    %c0_11 = arith.constant 0 : index
    %c1_12 = arith.constant 1 : index
    %c0_13 = arith.constant 0 : index
    %c0_14 = arith.constant 0 : index
    %11 = vector.load %arg2[%c0_11, %c1_12, %c0_13, %c0_14] : memref<2x2x16x128xbf16, #tpu.memory_space<vmem>>, vector<1x1x16x128xbf16>
    %12 = vector.shape_cast %11 : vector<1x1x16x128xbf16> to vector<16x128xbf16>
    %cst_15 = arith.constant dense<0.000000e+00> : vector<128x128xf32>
    %13 = tpu.matmul %10, %12, %cst_15 {dimension_numbers = #tpu.dot_dimension_numbers<[1], [0], [0], [1], [0, 0, 1, 1], [], []>} : vector<128x16xbf16>, vector<16x128xbf16>, vector<128x128xf32> -> vector<128x128xf32>
    %14 = arith.addf %7, %13 : vector<128x128xf32>
    %c0_16 = arith.constant 0 : index
    %c1_17 = arith.constant 1 : index
    %c0_18 = arith.constant 0 : index
    %c0_19 = arith.constant 0 : index
    %15 = vector.load %arg1[%c0_16, %c1_17, %c0_18, %c0_19] : memref<2x9x9x16xf32, #tpu.memory_space<vmem>>, vector<2x8x8x16xf32>
    %16 = vector.shape_cast %15 : vector<2x8x8x16xf32> to vector<128x16xf32>
    %17 = arith.truncf %16 : vector<128x16xf32> to vector<128x16xbf16>
    %c1_20 = arith.constant 1 : index
    %c0_21 = arith.constant 0 : index
    %c0_22 = arith.constant 0 : index
    %c0_23 = arith.constant 0 : index
    %18 = vector.load %arg2[%c1_20, %c0_21, %c0_22, %c0_23] : memref<2x2x16x128xbf16, #tpu.memory_space<vmem>>, vector<1x1x16x128xbf16>
    %19 = vector.shape_cast %18 : vector<1x1x16x128xbf16> to vector<16x128xbf16>
    %cst_24 = arith.constant dense<0.000000e+00> : vector<128x128xf32>
    %20 = tpu.matmul %17, %19, %cst_24 {dimension_numbers = #tpu.dot_dimension_numbers<[1], [0], [0], [1], [0, 0, 1, 1], [], []>} : vector<128x16xbf16>, vector<16x128xbf16>, vector<128x128xf32> -> vector<128x128xf32>
    %21 = arith.addf %14, %20 : vector<128x128xf32>
    %c0_25 = arith.constant 0 : index
    %c1_26 = arith.constant 1 : index
    %c1_27 = arith.constant 1 : index
    %c0_28 = arith.constant 0 : index
    %22 = vector.load %arg1[%c0_25, %c1_26, %c1_27, %c0_28] : memref<2x9x9x16xf32, #tpu.memory_space<vmem>>, vector<2x8x8x16xf32>
    %23 = vector.shape_cast %22 : vector<2x8x8x16xf32> to vector<128x16xf32>
    %24 = arith.truncf %23 : vector<128x16xf32> to vector<128x16xbf16>
    %c1_29 = arith.constant 1 : index
    %c1_30 = arith.constant 1 : index
    %c0_31 = arith.constant 0 : index
    %c0_32 = arith.constant 0 : index
    %25 = vector.load %arg2[%c1_29, %c1_30, %c0_31, %c0_32] : memref<2x2x16x128xbf16, #tpu.memory_space<vmem>>, vector<1x1x16x128xbf16>
    %26 = vector.shape_cast %25 : vector<1x1x16x128xbf16> to vector<16x128xbf16>
    %cst_33 = arith.constant dense<0.000000e+00> : vector<128x128xf32>
    %27 = tpu.matmul %24, %26, %cst_33 {dimension_numbers = #tpu.dot_dimension_numbers<[1], [0], [0], [1], [0, 0, 1, 1], [], []>} : vector<128x16xbf16>, vector<16x128xbf16>, vector<128x128xf32> -> vector<128x128xf32>
    %28 = arith.addf %21, %27 : vector<128x128xf32>
    %c0_34 = arith.constant 0 : index
    %c0_35 = arith.constant 0 : index
    %29 = vector.load %arg3[%c0_34, %c0_35] : memref<1x128xf32, #tpu.memory_space<vmem>>, vector<1x128xf32>
    %30 = vector.broadcast %29 : vector<1x128xf32> to vector<128x128xf32>
    %31 = arith.addf %28, %30 : vector<128x128xf32>
    %cst_36 = arith.constant 0.000000e+00 : f32
    %32 = vector.broadcast %cst_36 : f32 to vector<128x128xf32>
    %33 = arith.cmpf oge, %31, %32 : vector<128x128xf32>
    %cst_37 = arith.constant 0.00999999977 : f32
    %34 = vector.broadcast %cst_37 : f32 to vector<128x128xf32>
    %35 = arith.mulf %34, %31 : vector<128x128xf32>
    %36 = arith.select %33, %31, %35 : vector<128x128xi1>, vector<128x128xf32>
    %cst_38 = arith.constant 0.000000e+00 : f32
    %37 = vector.broadcast %cst_38 : f32 to vector<2x1x10x128xf32>
    %c0_39 = arith.constant 0 : index
    %c0_40 = arith.constant 0 : index
    %c7 = arith.constant 7 : index
    %c0_41 = arith.constant 0 : index
    %38 = vector.load %arg9[%c0_39, %c0_40, %c7, %c0_41] : memref<2x10x24x128xf32, #tpu.memory_space<vmem>>, vector<2x1x10x128xf32>
    tpu.vector_store %arg9[%c0_39, %c0_40, %c7, %c0_41], %37 {strides = array<i32>} : memref<2x10x24x128xf32, #tpu.memory_space<vmem>>, vector<2x1x10x128xf32>,
    %c0_42 = arith.constant 0 : index
    %c9 = arith.constant 9 : index
    %c7_43 = arith.constant 7 : index
    %c0_44 = arith.constant 0 : index
    %39 = vector.load %arg9[%c0_42, %c9, %c7_43, %c0_44] : memref<2x10x24x128xf32, #tpu.memory_space<vmem>>, vector<2x1x10x128xf32>
    tpu.vector_store %arg9[%c0_42, %c9, %c7_43, %c0_44], %37 {strides = array<i32>} : memref<2x10x24x128xf32, #tpu.memory_space<vmem>>, vector<2x1x10x128xf32>,
    %cst_45 = arith.constant 0.000000e+00 : f32
    %40 = vector.broadcast %cst_45 : f32 to vector<2x8x1x128xf32>
    %c0_46 = arith.constant 0 : index
    %c1_47 = arith.constant 1 : index
    %c7_48 = arith.constant 7 : index
    %c0_49 = arith.constant 0 : index
    %41 = vector.load %arg9[%c0_46, %c1_47, %c7_48, %c0_49] : memref<2x10x24x128xf32, #tpu.memory_space<vmem>>, vector<2x8x1x128xf32>
    tpu.vector_store %arg9[%c0_46, %c1_47, %c7_48, %c0_49], %40 {strides = array<i32>} : memref<2x10x24x128xf32, #tpu.memory_space<vmem>>, vector<2x8x1x128xf32>,
    %c0_50 = arith.constant 0 : index
    %c1_51 = arith.constant 1 : index
    %c16 = arith.constant 16 : index
    %c0_52 = arith.constant 0 : index
    %42 = vector.load %arg9[%c0_50, %c1_51, %c16, %c0_52] : memref<2x10x24x128xf32, #tpu.memory_space<vmem>>, vector<2x8x1x128xf32>
    tpu.vector_store %arg9[%c0_50, %c1_51, %c16, %c0_52], %40 {strides = array<i32>} : memref<2x10x24x128xf32, #tpu.memory_space<vmem>>, vector<2x8x1x128xf32>,
    %43 = vector.shape_cast %36 : vector<128x128xf32> to vector<2x8x8x128xf32>
    %c0_53 = arith.constant 0 : index
    %c1_54 = arith.constant 1 : index
    %c8 = arith.constant 8 : index
    %c0_55 = arith.constant 0 : index
    %44 = vector.load %arg9[%c0_53, %c1_54, %c8, %c0_55] : memref<2x10x24x128xf32, #tpu.memory_space<vmem>>, vector<2x8x8x128xf32>
    tpu.vector_store %arg9[%c0_53, %c1_54, %c8, %c0_55], %43 {strides = array<i32>} : memref<2x10x24x128xf32, #tpu.memory_space<vmem>>, vector<2x8x8x128xf32>,
    %cst_56 = arith.constant 0.000000e+00 : f32
    %45 = vector.broadcast %cst_56 : f32 to vector<128x128xf32>
    %c0_57 = arith.constant 0 : index
    %c0_58 = arith.constant 0 : index
    %c7_59 = arith.constant 7 : index
    %c0_60 = arith.constant 0 : index
    %46 = vector.load %arg9[%c0_57, %c0_58, %c7_59, %c0_60] : memref<2x10x24x128xf32, #tpu.memory_space<vmem>>, vector<2x8x8x128xf32>
    %47 = vector.shape_cast %46 : vector<2x8x8x128xf32> to vector<128x128xf32>
    %48 = arith.truncf %47 : vector<128x128xf32> to vector<128x128xbf16>
    %c0_61 = arith.constant 0 : index
    %c0_62 = arith.constant 0 : index
    %c0_63 = arith.constant 0 : index
    %c0_64 = arith.constant 0 : index
    %49 = vector.load %arg4[%c0_61, %c0_62, %c0_63, %c0_64] : memref<3x3x128x128xbf16, #tpu.memory_space<vmem>>, vector<1x1x128x128xbf16>
    %50 = vector.shape_cast %49 : vector<1x1x128x128xbf16> to vector<128x128xbf16>
    %cst_65 = arith.constant dense<0.000000e+00> : vector<128x128xf32>
    %51 = tpu.matmul %48, %50, %cst_65 {dimension_numbers = #tpu.dot_dimension_numbers<[1], [0], [0], [1], [0, 0, 1, 1], [], []>} : vector<128x128xbf16>, vector<128x128xbf16>, vector<128x128xf32> -> vector<128x128xf32>
    %52 = arith.addf %45, %51 : vector<128x128xf32>
    %c0_66 = arith.constant 0 : index
    %c0_67 = arith.constant 0 : index
    %c8_68 = arith.constant 8 : index
    %c0_69 = arith.constant 0 : index
    %53 = vector.load %arg9[%c0_66, %c0_67, %c8_68, %c0_69] : memref<2x10x24x128xf32, #tpu.memory_space<vmem>>, vector<2x8x8x128xf32>
    %54 = vector.shape_cast %53 : vector<2x8x8x128xf32> to vector<128x128xf32>
    %55 = arith.truncf %54 : vector<128x128xf32> to vector<128x128xbf16>
    %c0_70 = arith.constant 0 : index
    %c1_71 = arith.constant 1 : index
    %c0_72 = arith.constant 0 : index
    %c0_73 = arith.constant 0 : index
    %56 = vector.load %arg4[%c0_70, %c1_71, %c0_72, %c0_73] : memref<3x3x128x128xbf16, #tpu.memory_space<vmem>>, vector<1x1x128x128xbf16>
    %57 = vector.shape_cast %56 : vector<1x1x128x128xbf16> to vector<128x128xbf16>
    %cst_74 = arith.constant dense<0.000000e+00> : vector<128x128xf32>
    %58 = tpu.matmul %55, %57, %cst_74 {dimension_numbers = #tpu.dot_dimension_numbers<[1], [0], [0], [1], [0, 0, 1, 1], [], []>} : vector<128x128xbf16>, vector<128x128xbf16>, vector<128x128xf32> -> vector<128x128xf32>
    %59 = arith.addf %52, %58 : vector<128x128xf32>
    %c0_75 = arith.constant 0 : index
    %c0_76 = arith.constant 0 : index
    %c9_77 = arith.constant 9 : index
    %c0_78 = arith.constant 0 : index
    %60 = vector.load %arg9[%c0_75, %c0_76, %c9_77, %c0_78] : memref<2x10x24x128xf32, #tpu.memory_space<vmem>>, vector<2x8x8x128xf32>
    %61 = vector.shape_cast %60 : vector<2x8x8x128xf32> to vector<128x128xf32>
    %62 = arith.truncf %61 : vector<128x128xf32> to vector<128x128xbf16>
    %c0_79 = arith.constant 0 : index
    %c2 = arith.constant 2 : index
    %c0_80 = arith.constant 0 : index
    %c0_81 = arith.constant 0 : index
    %63 = vector.load %arg4[%c0_79, %c2, %c0_80, %c0_81] : memref<3x3x128x128xbf16, #tpu.memory_space<vmem>>, vector<1x1x128x128xbf16>
    %64 = vector.shape_cast %63 : vector<1x1x128x128xbf16> to vector<128x128xbf16>
    %cst_82 = arith.constant dense<0.000000e+00> : vector<128x128xf32>
    %65 = tpu.matmul %62, %64, %cst_82 {dimension_numbers = #tpu.dot_dimension_numbers<[1], [0], [0], [1], [0, 0, 1, 1], [], []>} : vector<128x128xbf16>, vector<128x128xbf16>, vector<128x128xf32> -> vector<128x128xf32>
    %66 = arith.addf %59, %65 : vector<128x128xf32>
    %c0_83 = arith.constant 0 : index
    %c1_84 = arith.constant 1 : index
    %c7_85 = arith.constant 7 : index
    %c0_86 = arith.constant 0 : index
    %67 = vector.load %arg9[%c0_83, %c1_84, %c7_85, %c0_86] : memref<2x10x24x128xf32, #tpu.memory_space<vmem>>, vector<2x8x8x128xf32>
    %68 = vector.shape_cast %67 : vector<2x8x8x128xf32> to vector<128x128xf32>
    %69 = arith.truncf %68 : vector<128x128xf32> to vector<128x128xbf16>
    %c1_87 = arith.constant 1 : index
    %c0_88 = arith.constant 0 : index
    %c0_89 = arith.constant 0 : index
    %c0_90 = arith.constant 0 : index
    %70 = vector.load %arg4[%c1_87, %c0_88, %c0_89, %c0_90] : memref<3x3x128x128xbf16, #tpu.memory_space<vmem>>, vector<1x1x128x128xbf16>
    %71 = vector.shape_cast %70 : vector<1x1x128x128xbf16> to vector<128x128xbf16>
    %cst_91 = arith.constant dense<0.000000e+00> : vector<128x128xf32>
    %72 = tpu.matmul %69, %71, %cst_91 {dimension_numbers = #tpu.dot_dimension_numbers<[1], [0], [0], [1], [0, 0, 1, 1], [], []>} : vector<128x128xbf16>, vector<128x128xbf16>, vector<128x128xf32> -> vector<128x128xf32>
    %73 = arith.addf %66, %72 : vector<128x128xf32>
    %c0_92 = arith.constant 0 : index
    %c1_93 = arith.constant 1 : index
    %c8_94 = arith.constant 8 : index
    %c0_95 = arith.constant 0 : index
    %74 = vector.load %arg9[%c0_92, %c1_93, %c8_94, %c0_95] : memref<2x10x24x128xf32, #tpu.memory_space<vmem>>, vector<2x8x8x128xf32>
    %75 = vector.shape_cast %74 : vector<2x8x8x128xf32> to vector<128x128xf32>
    %76 = arith.truncf %75 : vector<128x128xf32> to vector<128x128xbf16>
    %c1_96 = arith.constant 1 : index
    %c1_97 = arith.constant 1 : index
    %c0_98 = arith.constant 0 : index
    %c0_99 = arith.constant 0 : index
    %77 = vector.load %arg4[%c1_96, %c1_97, %c0_98, %c0_99] : memref<3x3x128x128xbf16, #tpu.memory_space<vmem>>, vector<1x1x128x128xbf16>
    %78 = vector.shape_cast %77 : vector<1x1x128x128xbf16> to vector<128x128xbf16>
    %cst_100 = arith.constant dense<0.000000e+00> : vector<128x128xf32>
    %79 = tpu.matmul %76, %78, %cst_100 {dimension_numbers = #tpu.dot_dimension_numbers<[1], [0], [0], [1], [0, 0, 1, 1], [], []>} : vector<128x128xbf16>, vector<128x128xbf16>, vector<128x128xf32> -> vector<128x128xf32>
    %80 = arith.addf %73, %79 : vector<128x128xf32>
    %c0_101 = arith.constant 0 : index
    %c1_102 = arith.constant 1 : index
    %c9_103 = arith.constant 9 : index
    %c0_104 = arith.constant 0 : index
    %81 = vector.load %arg9[%c0_101, %c1_102, %c9_103, %c0_104] : memref<2x10x24x128xf32, #tpu.memory_space<vmem>>, vector<2x8x8x128xf32>
    %82 = vector.shape_cast %81 : vector<2x8x8x128xf32> to vector<128x128xf32>
    %83 = arith.truncf %82 : vector<128x128xf32> to vector<128x128xbf16>
    %c1_105 = arith.constant 1 : index
    %c2_106 = arith.constant 2 : index
    %c0_107 = arith.constant 0 : index
    %c0_108 = arith.constant 0 : index
    %84 = vector.load %arg4[%c1_105, %c2_106, %c0_107, %c0_108] : memref<3x3x128x128xbf16, #tpu.memory_space<vmem>>, vector<1x1x128x128xbf16>
    %85 = vector.shape_cast %84 : vector<1x1x128x128xbf16> to vector<128x128xbf16>
    %cst_109 = arith.constant dense<0.000000e+00> : vector<128x128xf32>
    %86 = tpu.matmul %83, %85, %cst_109 {dimension_numbers = #tpu.dot_dimension_numbers<[1], [0], [0], [1], [0, 0, 1, 1], [], []>} : vector<128x128xbf16>, vector<128x128xbf16>, vector<128x128xf32> -> vector<128x128xf32>
    %87 = arith.addf %80, %86 : vector<128x128xf32>
    %c0_110 = arith.constant 0 : index
    %c2_111 = arith.constant 2 : index
    %c7_112 = arith.constant 7 : index
    %c0_113 = arith.constant 0 : index
    %88 = vector.load %arg9[%c0_110, %c2_111, %c7_112, %c0_113] : memref<2x10x24x128xf32, #tpu.memory_space<vmem>>, vector<2x8x8x128xf32>
    %89 = vector.shape_cast %88 : vector<2x8x8x128xf32> to vector<128x128xf32>
    %90 = arith.truncf %89 : vector<128x128xf32> to vector<128x128xbf16>
    %c2_114 = arith.constant 2 : index
    %c0_115 = arith.constant 0 : index
    %c0_116 = arith.constant 0 : index
    %c0_117 = arith.constant 0 : index
    %91 = vector.load %arg4[%c2_114, %c0_115, %c0_116, %c0_117] : memref<3x3x128x128xbf16, #tpu.memory_space<vmem>>, vector<1x1x128x128xbf16>
    %92 = vector.shape_cast %91 : vector<1x1x128x128xbf16> to vector<128x128xbf16>
    %cst_118 = arith.constant dense<0.000000e+00> : vector<128x128xf32>
    %93 = tpu.matmul %90, %92, %cst_118 {dimension_numbers = #tpu.dot_dimension_numbers<[1], [0], [0], [1], [0, 0, 1, 1], [], []>} : vector<128x128xbf16>, vector<128x128xbf16>, vector<128x128xf32> -> vector<128x128xf32>
    %94 = arith.addf %87, %93 : vector<128x128xf32>
    %c0_119 = arith.constant 0 : index
    %c2_120 = arith.constant 2 : index
    %c8_121 = arith.constant 8 : index
    %c0_122 = arith.constant 0 : index
    %95 = vector.load %arg9[%c0_119, %c2_120, %c8_121, %c0_122] : memref<2x10x24x128xf32, #tpu.memory_space<vmem>>, vector<2x8x8x128xf32>
    %96 = vector.shape_cast %95 : vector<2x8x8x128xf32> to vector<128x128xf32>
    %97 = arith.truncf %96 : vector<128x128xf32> to vector<128x128xbf16>
    %c2_123 = arith.constant 2 : index
    %c1_124 = arith.constant 1 : index
    %c0_125 = arith.constant 0 : index
    %c0_126 = arith.constant 0 : index
    %98 = vector.load %arg4[%c2_123, %c1_124, %c0_125, %c0_126] : memref<3x3x128x128xbf16, #tpu.memory_space<vmem>>, vector<1x1x128x128xbf16>
    %99 = vector.shape_cast %98 : vector<1x1x128x128xbf16> to vector<128x128xbf16>
    %cst_127 = arith.constant dense<0.000000e+00> : vector<128x128xf32>
    %100 = tpu.matmul %97, %99, %cst_127 {dimension_numbers = #tpu.dot_dimension_numbers<[1], [0], [0], [1], [0, 0, 1, 1], [], []>} : vector<128x128xbf16>, vector<128x128xbf16>, vector<128x128xf32> -> vector<128x128xf32>
    %101 = arith.addf %94, %100 : vector<128x128xf32>
    %c0_128 = arith.constant 0 : index
    %c2_129 = arith.constant 2 : index
    %c9_130 = arith.constant 9 : index
    %c0_131 = arith.constant 0 : index
    %102 = vector.load %arg9[%c0_128, %c2_129, %c9_130, %c0_131] : memref<2x10x24x128xf32, #tpu.memory_space<vmem>>, vector<2x8x8x128xf32>
    %103 = vector.shape_cast %102 : vector<2x8x8x128xf32> to vector<128x128xf32>
    %104 = arith.truncf %103 : vector<128x128xf32> to vector<128x128xbf16>
    %c2_132 = arith.constant 2 : index
    %c2_133 = arith.constant 2 : index
    %c0_134 = arith.constant 0 : index
    %c0_135 = arith.constant 0 : index
    %105 = vector.load %arg4[%c2_132, %c2_133, %c0_134, %c0_135] : memref<3x3x128x128xbf16, #tpu.memory_space<vmem>>, vector<1x1x128x128xbf16>
    %106 = vector.shape_cast %105 : vector<1x1x128x128xbf16> to vector<128x128xbf16>
    %cst_136 = arith.constant dense<0.000000e+00> : vector<128x128xf32>
    %107 = tpu.matmul %104, %106, %cst_136 {dimension_numbers = #tpu.dot_dimension_numbers<[1], [0], [0], [1], [0, 0, 1, 1], [], []>} : vector<128x128xbf16>, vector<128x128xbf16>, vector<128x128xf32> -> vector<128x128xf32>
    %108 = arith.addf %101, %107 : vector<128x128xf32>
    %c0_137 = arith.constant 0 : index
    %c0_138 = arith.constant 0 : index
    %109 = vector.load %arg5[%c0_137, %c0_138] : memref<1x128xf32, #tpu.memory_space<vmem>>, vector<1x128xf32>
    %110 = vector.broadcast %109 : vector<1x128xf32> to vector<128x128xf32>
    %111 = arith.addf %108, %110 : vector<128x128xf32>
    %cst_139 = arith.constant 0.000000e+00 : f32
    %112 = vector.broadcast %cst_139 : f32 to vector<128x128xf32>
    %113 = arith.cmpf oge, %111, %112 : vector<128x128xf32>
    %cst_140 = arith.constant 0.00999999977 : f32
    %114 = vector.broadcast %cst_140 : f32 to vector<128x128xf32>
    %115 = arith.mulf %114, %111 : vector<128x128xf32>
    %116 = arith.select %113, %111, %115 : vector<128x128xi1>, vector<128x128xf32>
    %117 = vector.shape_cast %116 : vector<128x128xf32> to vector<2x8x8x128xf32>
    %c0_141 = arith.constant 0 : index
    %c1_142 = arith.constant 1 : index
    %c8_143 = arith.constant 8 : index
    %c0_144 = arith.constant 0 : index
    %118 = vector.load %arg9[%c0_141, %c1_142, %c8_143, %c0_144] : memref<2x10x24x128xf32, #tpu.memory_space<vmem>>, vector<2x8x8x128xf32>
    tpu.vector_store %arg9[%c0_141, %c1_142, %c8_143, %c0_144], %117 {strides = array<i32>} : memref<2x10x24x128xf32, #tpu.memory_space<vmem>>, vector<2x8x8x128xf32>,
    %cst_145 = arith.constant 0.000000e+00 : f32
    %119 = vector.broadcast %cst_145 : f32 to vector<128x128xf32>
    %c0_146 = arith.constant 0 : index
    %c0_147 = arith.constant 0 : index
    %c7_148 = arith.constant 7 : index
    %c0_149 = arith.constant 0 : index
    %120 = vector.load %arg9[%c0_146, %c0_147, %c7_148, %c0_149] : memref<2x10x24x128xf32, #tpu.memory_space<vmem>>, vector<2x8x8x128xf32>
    %121 = vector.shape_cast %120 : vector<2x8x8x128xf32> to vector<128x128xf32>
    %122 = arith.truncf %121 : vector<128x128xf32> to vector<128x128xbf16>
    %c0_150 = arith.constant 0 : index
    %c0_151 = arith.constant 0 : index
    %c0_152 = arith.constant 0 : index
    %c0_153 = arith.constant 0 : index
    %123 = vector.load %arg6[%c0_150, %c0_151, %c0_152, %c0_153] : memref<3x3x128x128xbf16, #tpu.memory_space<vmem>>, vector<1x1x128x128xbf16>
    %124 = vector.shape_cast %123 : vector<1x1x128x128xbf16> to vector<128x128xbf16>
    %cst_154 = arith.constant dense<0.000000e+00> : vector<128x128xf32>
    %125 = tpu.matmul %122, %124, %cst_154 {dimension_numbers = #tpu.dot_dimension_numbers<[1], [0], [0], [1], [0, 0, 1, 1], [], []>} : vector<128x128xbf16>, vector<128x128xbf16>, vector<128x128xf32> -> vector<128x128xf32>
    %126 = arith.addf %119, %125 : vector<128x128xf32>
    %c0_155 = arith.constant 0 : index
    %c0_156 = arith.constant 0 : index
    %c8_157 = arith.constant 8 : index
    %c0_158 = arith.constant 0 : index
    %127 = vector.load %arg9[%c0_155, %c0_156, %c8_157, %c0_158] : memref<2x10x24x128xf32, #tpu.memory_space<vmem>>, vector<2x8x8x128xf32>
    %128 = vector.shape_cast %127 : vector<2x8x8x128xf32> to vector<128x128xf32>
    %129 = arith.truncf %128 : vector<128x128xf32> to vector<128x128xbf16>
    %c0_159 = arith.constant 0 : index
    %c1_160 = arith.constant 1 : index
    %c0_161 = arith.constant 0 : index
    %c0_162 = arith.constant 0 : index
    %130 = vector.load %arg6[%c0_159, %c1_160, %c0_161, %c0_162] : memref<3x3x128x128xbf16, #tpu.memory_space<vmem>>, vector<1x1x128x128xbf16>
    %131 = vector.shape_cast %130 : vector<1x1x128x128xbf16> to vector<128x128xbf16>
    %cst_163 = arith.constant dense<0.000000e+00> : vector<128x128xf32>
    %132 = tpu.matmul %129, %131, %cst_163 {dimension_numbers = #tpu.dot_dimension_numbers<[1], [0], [0], [1], [0, 0, 1, 1], [], []>} : vector<128x128xbf16>, vector<128x128xbf16>, vector<128x128xf32> -> vector<128x128xf32>
    %133 = arith.addf %126, %132 : vector<128x128xf32>
    %c0_164 = arith.constant 0 : index
    %c0_165 = arith.constant 0 : index
    %c9_166 = arith.constant 9 : index
    %c0_167 = arith.constant 0 : index
    %134 = vector.load %arg9[%c0_164, %c0_165, %c9_166, %c0_167] : memref<2x10x24x128xf32, #tpu.memory_space<vmem>>, vector<2x8x8x128xf32>
    %135 = vector.shape_cast %134 : vector<2x8x8x128xf32> to vector<128x128xf32>
    %136 = arith.truncf %135 : vector<128x128xf32> to vector<128x128xbf16>
    %c0_168 = arith.constant 0 : index
    %c2_169 = arith.constant 2 : index
    %c0_170 = arith.constant 0 : index
    %c0_171 = arith.constant 0 : index
    %137 = vector.load %arg6[%c0_168, %c2_169, %c0_170, %c0_171] : memref<3x3x128x128xbf16, #tpu.memory_space<vmem>>, vector<1x1x128x128xbf16>
    %138 = vector.shape_cast %137 : vector<1x1x128x128xbf16> to vector<128x128xbf16>
    %cst_172 = arith.constant dense<0.000000e+00> : vector<128x128xf32>
    %139 = tpu.matmul %136, %138, %cst_172 {dimension_numbers = #tpu.dot_dimension_numbers<[1], [0], [0], [1], [0, 0, 1, 1], [], []>} : vector<128x128xbf16>, vector<128x128xbf16>, vector<128x128xf32> -> vector<128x128xf32>
    %140 = arith.addf %133, %139 : vector<128x128xf32>
    %c0_173 = arith.constant 0 : index
    %c1_174 = arith.constant 1 : index
    %c7_175 = arith.constant 7 : index
    %c0_176 = arith.constant 0 : index
    %141 = vector.load %arg9[%c0_173, %c1_174, %c7_175, %c0_176] : memref<2x10x24x128xf32, #tpu.memory_space<vmem>>, vector<2x8x8x128xf32>
    %142 = vector.shape_cast %141 : vector<2x8x8x128xf32> to vector<128x128xf32>
    %143 = arith.truncf %142 : vector<128x128xf32> to vector<128x128xbf16>
    %c1_177 = arith.constant 1 : index
    %c0_178 = arith.constant 0 : index
    %c0_179 = arith.constant 0 : index
    %c0_180 = arith.constant 0 : index
    %144 = vector.load %arg6[%c1_177, %c0_178, %c0_179, %c0_180] : memref<3x3x128x128xbf16, #tpu.memory_space<vmem>>, vector<1x1x128x128xbf16>
    %145 = vector.shape_cast %144 : vector<1x1x128x128xbf16> to vector<128x128xbf16>
    %cst_181 = arith.constant dense<0.000000e+00> : vector<128x128xf32>
    %146 = tpu.matmul %143, %145, %cst_181 {dimension_numbers = #tpu.dot_dimension_numbers<[1], [0], [0], [1], [0, 0, 1, 1], [], []>} : vector<128x128xbf16>, vector<128x128xbf16>, vector<128x128xf32> -> vector<128x128xf32>
    %147 = arith.addf %140, %146 : vector<128x128xf32>
    %c0_182 = arith.constant 0 : index
    %c1_183 = arith.constant 1 : index
    %c8_184 = arith.constant 8 : index
    %c0_185 = arith.constant 0 : index
    %148 = vector.load %arg9[%c0_182, %c1_183, %c8_184, %c0_185] : memref<2x10x24x128xf32, #tpu.memory_space<vmem>>, vector<2x8x8x128xf32>
    %149 = vector.shape_cast %148 : vector<2x8x8x128xf32> to vector<128x128xf32>
    %150 = arith.truncf %149 : vector<128x128xf32> to vector<128x128xbf16>
    %c1_186 = arith.constant 1 : index
    %c1_187 = arith.constant 1 : index
    %c0_188 = arith.constant 0 : index
    %c0_189 = arith.constant 0 : index
    %151 = vector.load %arg6[%c1_186, %c1_187, %c0_188, %c0_189] : memref<3x3x128x128xbf16, #tpu.memory_space<vmem>>, vector<1x1x128x128xbf16>
    %152 = vector.shape_cast %151 : vector<1x1x128x128xbf16> to vector<128x128xbf16>
    %cst_190 = arith.constant dense<0.000000e+00> : vector<128x128xf32>
    %153 = tpu.matmul %150, %152, %cst_190 {dimension_numbers = #tpu.dot_dimension_numbers<[1], [0], [0], [1], [0, 0, 1, 1], [], []>} : vector<128x128xbf16>, vector<128x128xbf16>, vector<128x128xf32> -> vector<128x128xf32>
    %154 = arith.addf %147, %153 : vector<128x128xf32>
    %c0_191 = arith.constant 0 : index
    %c1_192 = arith.constant 1 : index
    %c9_193 = arith.constant 9 : index
    %c0_194 = arith.constant 0 : index
    %155 = vector.load %arg9[%c0_191, %c1_192, %c9_193, %c0_194] : memref<2x10x24x128xf32, #tpu.memory_space<vmem>>, vector<2x8x8x128xf32>
    %156 = vector.shape_cast %155 : vector<2x8x8x128xf32> to vector<128x128xf32>
    %157 = arith.truncf %156 : vector<128x128xf32> to vector<128x128xbf16>
    %c1_195 = arith.constant 1 : index
    %c2_196 = arith.constant 2 : index
    %c0_197 = arith.constant 0 : index
    %c0_198 = arith.constant 0 : index
    %158 = vector.load %arg6[%c1_195, %c2_196, %c0_197, %c0_198] : memref<3x3x128x128xbf16, #tpu.memory_space<vmem>>, vector<1x1x128x128xbf16>
    %159 = vector.shape_cast %158 : vector<1x1x128x128xbf16> to vector<128x128xbf16>
    %cst_199 = arith.constant dense<0.000000e+00> : vector<128x128xf32>
    %160 = tpu.matmul %157, %159, %cst_199 {dimension_numbers = #tpu.dot_dimension_numbers<[1], [0], [0], [1], [0, 0, 1, 1], [], []>} : vector<128x128xbf16>, vector<128x128xbf16>, vector<128x128xf32> -> vector<128x128xf32>
    %161 = arith.addf %154, %160 : vector<128x128xf32>
    %c0_200 = arith.constant 0 : index
    %c2_201 = arith.constant 2 : index
    %c7_202 = arith.constant 7 : index
    %c0_203 = arith.constant 0 : index
    %162 = vector.load %arg9[%c0_200, %c2_201, %c7_202, %c0_203] : memref<2x10x24x128xf32, #tpu.memory_space<vmem>>, vector<2x8x8x128xf32>
    %163 = vector.shape_cast %162 : vector<2x8x8x128xf32> to vector<128x128xf32>
    %164 = arith.truncf %163 : vector<128x128xf32> to vector<128x128xbf16>
    %c2_204 = arith.constant 2 : index
    %c0_205 = arith.constant 0 : index
    %c0_206 = arith.constant 0 : index
    %c0_207 = arith.constant 0 : index
    %165 = vector.load %arg6[%c2_204, %c0_205, %c0_206, %c0_207] : memref<3x3x128x128xbf16, #tpu.memory_space<vmem>>, vector<1x1x128x128xbf16>
    %166 = vector.shape_cast %165 : vector<1x1x128x128xbf16> to vector<128x128xbf16>
    %cst_208 = arith.constant dense<0.000000e+00> : vector<128x128xf32>
    %167 = tpu.matmul %164, %166, %cst_208 {dimension_numbers = #tpu.dot_dimension_numbers<[1], [0], [0], [1], [0, 0, 1, 1], [], []>} : vector<128x128xbf16>, vector<128x128xbf16>, vector<128x128xf32> -> vector<128x128xf32>
    %168 = arith.addf %161, %167 : vector<128x128xf32>
    %c0_209 = arith.constant 0 : index
    %c2_210 = arith.constant 2 : index
    %c8_211 = arith.constant 8 : index
    %c0_212 = arith.constant 0 : index
    %169 = vector.load %arg9[%c0_209, %c2_210, %c8_211, %c0_212] : memref<2x10x24x128xf32, #tpu.memory_space<vmem>>, vector<2x8x8x128xf32>
    %170 = vector.shape_cast %169 : vector<2x8x8x128xf32> to vector<128x128xf32>
    %171 = arith.truncf %170 : vector<128x128xf32> to vector<128x128xbf16>
    %c2_213 = arith.constant 2 : index
    %c1_214 = arith.constant 1 : index
    %c0_215 = arith.constant 0 : index
    %c0_216 = arith.constant 0 : index
    %172 = vector.load %arg6[%c2_213, %c1_214, %c0_215, %c0_216] : memref<3x3x128x128xbf16, #tpu.memory_space<vmem>>, vector<1x1x128x128xbf16>
    %173 = vector.shape_cast %172 : vector<1x1x128x128xbf16> to vector<128x128xbf16>
    %cst_217 = arith.constant dense<0.000000e+00> : vector<128x128xf32>
    %174 = tpu.matmul %171, %173, %cst_217 {dimension_numbers = #tpu.dot_dimension_numbers<[1], [0], [0], [1], [0, 0, 1, 1], [], []>} : vector<128x128xbf16>, vector<128x128xbf16>, vector<128x128xf32> -> vector<128x128xf32>
    %175 = arith.addf %168, %174 : vector<128x128xf32>
    %c0_218 = arith.constant 0 : index
    %c2_219 = arith.constant 2 : index
    %c9_220 = arith.constant 9 : index
    %c0_221 = arith.constant 0 : index
    %176 = vector.load %arg9[%c0_218, %c2_219, %c9_220, %c0_221] : memref<2x10x24x128xf32, #tpu.memory_space<vmem>>, vector<2x8x8x128xf32>
    %177 = vector.shape_cast %176 : vector<2x8x8x128xf32> to vector<128x128xf32>
    %178 = arith.truncf %177 : vector<128x128xf32> to vector<128x128xbf16>
    %c2_222 = arith.constant 2 : index
    %c2_223 = arith.constant 2 : index
    %c0_224 = arith.constant 0 : index
    %c0_225 = arith.constant 0 : index
    %179 = vector.load %arg6[%c2_222, %c2_223, %c0_224, %c0_225] : memref<3x3x128x128xbf16, #tpu.memory_space<vmem>>, vector<1x1x128x128xbf16>
    %180 = vector.shape_cast %179 : vector<1x1x128x128xbf16> to vector<128x128xbf16>
    %cst_226 = arith.constant dense<0.000000e+00> : vector<128x128xf32>
    %181 = tpu.matmul %178, %180, %cst_226 {dimension_numbers = #tpu.dot_dimension_numbers<[1], [0], [0], [1], [0, 0, 1, 1], [], []>} : vector<128x128xbf16>, vector<128x128xbf16>, vector<128x128xf32> -> vector<128x128xf32>
    %182 = arith.addf %175, %181 : vector<128x128xf32>
    %c0_227 = arith.constant 0 : index
    %c0_228 = arith.constant 0 : index
    %183 = vector.load %arg7[%c0_227, %c0_228] : memref<1x128xf32, #tpu.memory_space<vmem>>, vector<1x128xf32>
    %184 = vector.broadcast %183 : vector<1x128xf32> to vector<128x128xf32>
    %185 = arith.addf %182, %184 : vector<128x128xf32>
    %cst_229 = arith.constant 0.000000e+00 : f32
    %186 = vector.broadcast %cst_229 : f32 to vector<128x128xf32>
    %187 = arith.cmpf oge, %185, %186 : vector<128x128xf32>
    %cst_230 = arith.constant 0.00999999977 : f32
    %188 = vector.broadcast %cst_230 : f32 to vector<128x128xf32>
    %189 = arith.mulf %188, %185 : vector<128x128xf32>
    %190 = arith.select %187, %185, %189 : vector<128x128xi1>, vector<128x128xf32>
    %191 = vector.shape_cast %190 : vector<128x128xf32> to vector<2x64x128xf32>
    %c0_231 = arith.constant 0 : index
    %c0_232 = arith.constant 0 : index
    %c0_233 = arith.constant 0 : index
    %192 = vector.load %arg8[%c0_231, %c0_232, %c0_233] : memref<2x64x128xf32, #tpu.memory_space<vmem>>, vector<2x64x128xf32>
    tpu.vector_store %arg8[%c0_231, %c0_232, %c0_233], %191 {strides = array<i32>} : memref<2x64x128xf32, #tpu.memory_space<vmem>>, vector<2x64x128xf32>,
    return
  }
  func.func @transform_0(%arg0: i32) -> (i32, i32, i32, i32) {
    %c0_i32 = arith.constant 0 : i32
    %c0_i32_0 = arith.constant 0 : i32
    %c0_i32_1 = arith.constant 0 : i32
    %c0_i32_2 = arith.constant 0 : i32
    return %arg0, %c0_i32, %c0_i32_0, %c0_i32_1 : i32, i32, i32, i32
  }
  func.func @transform_1(%arg0: i32) -> (i32, i32, i32, i32) {
    %c0_i32 = arith.constant 0 : i32
    %c0_i32_0 = arith.constant 0 : i32
    %c0_i32_1 = arith.constant 0 : i32
    %c0_i32_2 = arith.constant 0 : i32
    %c0_i32_3 = arith.constant 0 : i32
    return %c0_i32, %c0_i32_0, %c0_i32_1, %c0_i32_2 : i32, i32, i32, i32
  }
  func.func @transform_2(%arg0: i32) -> (i32, i32) {
    %c0_i32 = arith.constant 0 : i32
    %c0_i32_0 = arith.constant 0 : i32
    %c0_i32_1 = arith.constant 0 : i32
    return %c0_i32, %c0_i32_0 : i32, i32
  }
  func.func @transform_3(%arg0: i32) -> (i32, i32, i32, i32) {
    %c0_i32 = arith.constant 0 : i32
    %c0_i32_0 = arith.constant 0 : i32
    %c0_i32_1 = arith.constant 0 : i32
    %c0_i32_2 = arith.constant 0 : i32
    %c0_i32_3 = arith.constant 0 : i32
    return %c0_i32, %c0_i32_0, %c0_i32_1, %c0_i32_2 : i32, i32, i32, i32
  }
  func.func @transform_4(%arg0: i32) -> (i32, i32) {
    %c0_i32 = arith.constant 0 : i32
    %c0_i32_0 = arith.constant 0 : i32
    %c0_i32_1 = arith.constant 0 : i32
    return %c0_i32, %c0_i32_0 : i32, i32
  }
  func.func @transform_5(%arg0: i32) -> (i32, i32, i32, i32) {
    %c0_i32 = arith.constant 0 : i32
    %c0_i32_0 = arith.constant 0 : i32
    %c0_i32_1 = arith.constant 0 : i32
    %c0_i32_2 = arith.constant 0 : i32
    %c0_i32_3 = arith.constant 0 : i32
    return %c0_i32, %c0_i32_0, %c0_i32_1, %c0_i32_2 : i32, i32, i32, i32
  }
  func.func @transform_6(%arg0: i32) -> (i32, i32) {
    %c0_i32 = arith.constant 0 : i32
    %c0_i32_0 = arith.constant 0 : i32
    %c0_i32_1 = arith.constant 0 : i32
    return %c0_i32, %c0_i32_0 : i32, i32
  }
  func.func @transform_7(%arg0: i32) -> (i32, i32, i32) {
    %c0_i32 = arith.constant 0 : i32
    %c0_i32_0 = arith.constant 0 : i32
    %c0_i32_1 = arith.constant 0 : i32
    return %arg0, %c0_i32, %c0_i32_0 : i32, i32, i32
  }
}

</mosaic_0001>

<bundles_post_ra>
// kernel: tpu_custom_call.1
= control target key start
LH: loop header
LB: loop body
LE: loop exit
PB: predicated region body
PF: predicated region fallthrough
CT: control target
= control target key end

     0   :  { %12 = vsyncpa [#allocation4], 0  ;;  %s7318_s0 = inlined_call_operand.vmem [shape: f32[2,9,9,16], index: 0, kind: input, shape index: {}]   ;;  %s7319_s1 = inlined_call_operand.vmem [shape: bf16[2,2,16,128], index: 1, kind: input, shape index: {}]   ;;  %s7320_s2 = inlined_call_operand.vmem [shape: f32[1,128], index: 2, kind: input, shape index: {}]   ;;  %s7321_s3 = inlined_call_operand.hbm [shape: bf16[3,3,128,128], index: 3, kind: input, shape index: {}]   ;;  %s7322_s4 = inlined_call_operand.vmem [shape: f32[1,128], index: 4, kind: input, shape index: {}]   ;;  %s7323_s5 = inlined_call_operand.hbm [shape: bf16[3,3,128,128], index: 5, kind: input, shape index: {}]   ;;  %s7324_s6 = inlined_call_operand.vmem [shape: f32[1,128], index: 6, kind: input, shape index: {}]   ;;  %s7325_s7 = inlined_call_operand.hbm [shape: f32[2,64,128], index: 7, kind: output, shape index: {}]  }
   0x1   :  { %13 = vsyncpa [#allocation7], 0 }
   0x2   :  { %14 = vsyncpa [#allocation5], 0  ;;  %s6323_s24 = smov [#allocation3]   ;;  %s6251_s28 = scalar_lea.hbm %s7321_s3, 9216 }
   0x3   :  { %s26_s25 = sshll.u32 %s6323_s24, 4  ;;  %p6252_p0 = scmp.ne.s32.totalorder %s7321_s3, %s6251_s28  ;;  %s27_s25 = int_to_ptr.vmem [resolvable:$true] %s26_s25 }
   0x4   :  { %p6255_p1 = scmp.lt.u32.totalorder %s6251_s28, %s7321_s3 }
   0x6   :  { %p6257_p2 = pnand %p6255_p1, %p6252_p0 }
   0x8   :  { %6260 = shalt.err (!%p6257_p2)
}
   0x9   :  { %s6261_s10 = scalar_lea.vmem %s27_s25, 9216  ;;  %p6266_p4 = scmp.lt.s32.totalorder %s27_s25, %s27_s25 }
   0xa   :  { %p6262_p3 = scmp.ne.s32.totalorder %s27_s25, %s6261_s10  ;;  %p6267_p5 = scmp.lt.s32.totalorder %s6261_s10, %s6261_s10 }
   0xc   :  { %p6268_p6 = por %p6267_p5, %p6266_p4 }
   0xe   :  { %p6269_p7 = pnand %p6268_p6, %p6262_p3 }
  0x10   :  { %6272 = shalt.err (!%p6269_p7)
}
  0x11   :  { %s6324_s11 = smov 64   ;;  %s6325_s12 = smov 4  }
  0x12   :  { %32 = dma.hbm_to_vmem [thread:$0]  %s7321_s3, 9216, %s27_s25, [#allocation4], %s6324_s11, %s6324_s11, %s6325_s12  }
  0x13   :  { %s6326_s15 = smov [#allocation6]   ;;  %s6273_s19 = scalar_lea.hbm %s7323_s5, 9216 }
  0x14   :  { %s40_s16 = sshll.u32 %s6326_s15, 4  ;;  %p6274_p8 = scmp.ne.s32.totalorder %s7323_s5, %s6273_s19  ;;  %s41_s16 = int_to_ptr.vmem [resolvable:$true] %s40_s16 }
  0x15   :  { %p6277_p9 = scmp.lt.u32.totalorder %s6273_s19, %s7323_s5 }
  0x17   :  { %p6279_p10 = pnand %p6277_p9, %p6274_p8 }
  0x19   :  { %6282 = shalt.err (!%p6279_p10)
}
  0x1a   :  { %s6283_s24 = scalar_lea.vmem %s41_s16, 9216  ;;  %p6288_p12 = scmp.lt.s32.totalorder %s41_s16, %s41_s16 }
  0x1b   :  { %p6284_p11 = scmp.ne.s32.totalorder %s41_s16, %s6283_s24  ;;  %p6289_p13 = scmp.lt.s32.totalorder %s6283_s24, %s6283_s24 }
  0x1d   :  { %p6290_p0 = por %p6289_p13, %p6288_p12 }
  0x1f   :  { %p6291_p1 = pnand %p6290_p0, %p6284_p11 }
  0x21   :  { %6294 = shalt.err (!%p6291_p1)
}
  0x22   :  { %46 = dma.hbm_to_vmem [thread:$0]  %s7323_s5, 9216, %s41_s16, [#allocation7], %s6324_s11, %s6324_s11, %s6325_s12  }
  0x23   :  { %6317 = dma.done.wait [#allocation4], 9216  }
  0x24   :  { %6318 = vsyncadd [#allocation4], 4294958080 }
  0x25   :  { %6319 = dma.done.wait [#allocation7], 9216  }
  0x26   :  { %6320 = vsyncadd [#allocation7], 4294958080  ;;  %v6102_v0 = vld [vmem:[%s7319_s1 + $0x8] sm:$0xff]   ;;  %v6103_v1 = vld [vmem:[%s7319_s1 + $0x10] sm:$0xff]   ;;  %vm115_vm0 = vcmask 130048  }
  0x27   :  { %5142 = vmatprep.subr.bf16.mxu1 %v6102_v0  ;;  %v82_v2 = vld [vmem:[%s7318_s0 + $0x1] sm:$0xff]  ;;  %v6407_v3 = vld [vmem:[%s7318_s0 + $0x11] sm:$0xff]  ;;  %5178 = vmatprep.subr.bf16.mxu0 %v6103_v1 }
  0x28   :  { %v6412_v4 = vld [vmem:[%s7318_s0 + $0x10] sm:$0xff]  ;;  %5143 = vmatpush3.bf16.msra.mxu1 %v6102_v0  ;;  %v98_v5 = vpack.c.bf16 %v6407_v3, %v82_v2  ;;  %v6418_v6 = vld [vmem:[%s7318_s0 + $0x20] sm:$0xff]  ;;  %5179 = vmatpush3.bf16.msra.mxu0 %v6103_v1  ;;  %v6105_v15 = vld [vmem:[%s7319_s1 + $0x18] sm:$0xff]  }
  0x29   :  { %v6423_v7 = vld [vmem:[%s7318_s0 + $0x21] sm:$0xff]  ;;  %v6428_v8 = vld [vmem:[%s7318_s0 + $0x31] sm:$0xff]  ;;  %v381_v9 = vpack.c.bf16 %v6418_v6, %v6412_v4  ;;  %5196 = vmatprep.subr.bf16.mxu0 %v6105_v15 }
  0x2a   :  { %v99_v10 = vpack.c.bf16 %v6428_v8, %v6423_v7  ;;  %v6104_v11 = vld [vmem:[%s7319_s1] sm:$0xff]   ;;  %5144 = vmatprep.mubr.msk.bf16.mxu1 %vm115_vm0, %v98_v5  ;;  %v6441_v12 = vld [vmem:[%s7318_s0 + $0x30] sm:$0xff]  ;;  %v551_v55 = vpack.c.bf16 %v6423_v7, %v6407_v3  ;;  %v6107_v57 = vld [vmem:[#allocation3 + $0x48] sm:$0xff]  }
  0x2b   :  { %v6446_v13 = vld [vmem:[%s7318_s0 + $0x40] sm:$0xff]  ;;  %5180 = vmatprep.mubr.msk.bf16.mxu0 %vm115_vm0, %v381_v9  ;;  %5160 = vmatprep.subr.bf16.mxu1 %v6104_v11  ;;  %v6463_v17 = vld [vmem:[%s7318_s0 + $0x51] sm:$0xff]  ;;  %v73_v56 = vpack.c.bf16 %v6441_v12, %v6418_v6 }
  0x2c   :  { %5145 = vmatmul.mubr.msk.bf16.vlgmr.msra.gmra.mrb[0].mxu1 %vm115_vm0, %v99_v10  ;;  %v382_v14 = vpack.c.bf16 %v6446_v13, %v6441_v12  ;;  %v6458_v16 = vld [vmem:[%s7318_s0 + $0x41] sm:$0xff]  ;;  %v6468_v18 = vld [vmem:[%s7318_s0 + $0x50] sm:$0xff] }
  0x2d   :  { %v6473_v19 = vld [vmem:[%s7318_s0 + $0x60] sm:$0xff]  ;;  %v100_v20 = vpack.c.bf16 %v6463_v17, %v6458_v16  ;;  %v6488_v23 = vld [vmem:[%s7318_s0 + $0x71] sm:$0xff]  ;;  %5161 = vmatpush3.bf16.msra.mxu1 %v6104_v11  ;;  %v74_v58 = vpack.c.bf16 %v6468_v18, %v6446_v13  ;;  %v552_v59 = vpack.c.bf16 %v6458_v16, %v6428_v8  ;;  %v6111_v13 = vld [vmem:[#allocation3 + $0x68] sm:$0xff]  }
  0x2e   :  { %5181 = vmatmul.mubr.msk.bf16.vlgmr.msra.gmra.mrb[0].mxu0 %vm115_vm0, %v382_v14  ;;  %v383_v21 = vpack.c.bf16 %v6473_v19, %v6468_v18  ;;  %v6483_v22 = vld [vmem:[%s7318_s0 + $0x61] sm:$0xff]  ;;  %v6493_v24 = vld [vmem:[%s7318_s0 + $0x70] sm:$0xff]  ;;  %v6109_v11 = vld [vmem:[#allocation3 + $0x58] sm:$0xff]   ;;  %v7326_v14 = vmov 0.0  }
  0x2f   :  { %5197 = vmatpush3.bf16.msra.mxu0 %v6105_v15  ;;  %v4624_v25 = vld [vmem:[%s7318_s0 + $0x80] sm:$0xff]  ;;  %v90_v26 = vld [vmem:[%s7318_s0 + $0x91] sm:$0xff]  ;;  %5148 = vmatprep.mubr.msk.bf16.mxu1 %vm115_vm0, %v100_v20  ;;  %v101_v28 = vpack.c.bf16 %v6488_v23, %v6483_v22  ;;  %v553_v60 = vpack.c.bf16 %v6483_v22, %v6463_v17  ;;  %v75_v0 = vpack.c.bf16 %v6493_v24, %v6473_v19 }
  0x30   :  { %v6504_v27 = vld [vmem:[%s7318_s0 + $0xa1] sm:$0xff]  ;;  %5184 = vmatprep.mubr.msk.bf16.mxu0 %vm115_vm0, %v383_v21  ;;  %v6516_v30 = vld [vmem:[%s7318_s0 + $0xb0] sm:$0xff]  ;;  %v384_v32 = vpack.c.bf16 %v4624_v25, %v6493_v24  ;;  %776 = vst [vmem:[#allocation2 + $0x7] sm:$0xff] %v7326_v14  ;;  %777 = vst [vmem:[#allocation2 + $0xf] sm:$0x3] %v7326_v14 }
  0x31   :  { %v4625_v29 = vld [vmem:[%s7318_s0 + $0xa0] sm:$0xff]  ;;  %v102_v31 = vpack.c.bf16 %v6504_v27, %v90_v26  ;;  %v92_v34 = vld [vmem:[%s7318_s0 + $0xb1] sm:$0xff]  ;;  %778 = vst [vmem:[#allocation2 + $0xf7] sm:$0xff] %v7326_v14  ;;  %779 = vst [vmem:[#allocation2 + $0xff] sm:$0x3] %v7326_v14 }
  0x32   :  { %v385_v33 = vpack.c.bf16 %v6516_v30, %v4625_v29  ;;  %v6528_v35 = vld [vmem:[%s7318_s0 + $0xc1] sm:$0xff]  ;;  %v4628_v37 = vld [vmem:[%s7318_s0 + $0xd0] sm:$0xff]  ;;  %v555_v3 = vpack.c.bf16 %v92_v34, %v6504_v27  ;;  %781 = vst [vmem:[#allocation2 + $0xdf] sm:$0xff] %v7326_v14  ;;  %782 = vst [vmem:[#allocation2 + $0xe7] sm:$0x3] %v7326_v14 }
  0x33   :  { %v4627_v36 = vld [vmem:[%s7318_s0 + $0xc0] sm:$0xff]  ;;  %v94_v38 = vld [vmem:[%s7318_s0 + $0xd1] sm:$0xff]  ;;  %v103_v42 = vpack.c.bf16 %v6528_v35, %v92_v34  ;;  %783 = vst [vmem:[#allocation2 + $0x1cf] sm:$0xff] %v7326_v14  ;;  %784 = vst [vmem:[#allocation2 + $0x1d7] sm:$0x3] %v7326_v14 }
  0x34   :  { %5149 = vmatmul.mubr.msk.bf16.gmra.mrb[4].mxu1 %vm115_vm0, %v101_v28  ;;  %v95_v39 = vld [vmem:[%s7318_s0 + $0xe1] sm:$0xff]  ;;  %v4630_v43 = vld [vmem:[%s7318_s0 + $0xf0] sm:$0xff]  ;;  %v386_v45 = vpack.c.bf16 %v4628_v37, %v4627_v36  ;;  %v556_v6 = vpack.c.bf16 %v94_v38, %v6528_v35  ;;  %786 = vst [vmem:[#allocation2 + $0x1f] sm:$0x1] %v7326_v14  ;;  %787 = vst [vmem:[#allocation2 + $0x37] sm:$0x1] %v7326_v14 }
  0x35   :  { %5152 = vmatprep.mubr.msk.bf16.mxu1 %vm115_vm0, %v102_v31  ;;  %v6106_v40 = vld [vmem:[#allocation3 + $0x40] sm:$0xff]   ;;  %v104_v44 = vpack.c.bf16 %v95_v39, %v94_v38  ;;  %v96_v47 = vld [vmem:[%s7318_s0 + $0xf1] sm:$0xff]  ;;  %788 = vst [vmem:[#allocation2 + $0x4f] sm:$0x1] %v7326_v14  ;;  %789 = vst [vmem:[#allocation2 + $0x67] sm:$0x1] %v7326_v14 }
  0x36   :  { %5185 = vmatmul.mubr.msk.bf16.gmra.mrb[4].mxu0 %vm115_vm0, %v384_v32  ;;  %v4629_v41 = vld [vmem:[%s7318_s0 + $0xe0] sm:$0xff]  ;;  %5214 = vmatprep.subr.bf16.mxu1 %v6106_v40  ;;  %v4632_v51 = vld [vmem:[%s7318_s0 + $0x110] sm:$0xff]  ;;  %v557_v7 = vpack.c.bf16 %v96_v47, %v95_v39  ;;  %790 = vst [vmem:[#allocation2 + $0x7f] sm:$0x1] %v7326_v14  ;;  %791 = vst [vmem:[#allocation2 + $0x97] sm:$0x1] %v7326_v14 }
  0x37   :  { %5188 = vmatprep.mubr.msk.bf16.mxu0 %vm115_vm0, %v385_v33  ;;  %v387_v46 = vpack.c.bf16 %v4630_v43, %v4629_v41  ;;  %v97_v48 = vld [vmem:[%s7318_s0 + $0x101] sm:$0xff]  ;;  %v64_v61 = vld [vmem:[%s7318_s0 + $0x90] sm:$0xff]  ;;  %v78_v5 = vpack.c.bf16 %v4629_v41, %v4628_v37  ;;  %792 = vst [vmem:[#allocation2 + $0xaf] sm:$0x1] %v7326_v14  ;;  %793 = vst [vmem:[#allocation2 + $0xc7] sm:$0x1] %v7326_v14 }
  0x38   :  { %v56_v49 = vld [vmem:[%s7318_s0] sm:$0xff]  ;;  %v105_v52 = vpack.c.bf16 %v97_v48, %v96_v47  ;;  %v6108_v62 = vld [vmem:[#allocation3 + $0x50] sm:$0xff]   ;;  %v76_v1 = vpack.c.bf16 %v4625_v29, %v64_v61  ;;  %794 = vst [vmem:[#allocation2 + $0x10f] sm:$0x1] %v7326_v14  ;;  %795 = vst [vmem:[#allocation2 + $0x127] sm:$0x1] %v7326_v14 }
  0x39   :  { %v4631_v50 = vld [vmem:[%s7318_s0 + $0x100] sm:$0xff]  ;;  %v72_v53 = vpack.c.bf16 %v6412_v4, %v56_v49  ;;  %v77_v4 = vpack.c.bf16 %v4627_v36, %v6516_v30  ;;  %v4659_v8 = vld [vmem:[%s7318_s0 + $0x111] sm:$0xff]  ;;  %796 = vst [vmem:[#allocation2 + $0x13f] sm:$0x1] %v7326_v14  ;;  %797 = vst [vmem:[#allocation2 + $0x157] sm:$0x1] %v7326_v14 }
  0x3a   :  { %v388_v54 = vpack.c.bf16 %v4632_v51, %v4631_v50  ;;  %v4651_v63 = vld [vmem:[%s7318_s0 + $0x81] sm:$0xff]  ;;  %v79_v9 = vpack.c.bf16 %v4631_v50, %v4630_v43  ;;  %v558_v10 = vpack.c.bf16 %v4659_v8, %v97_v48  ;;  %798 = vst [vmem:[#allocation2 + $0x16f] sm:$0x1] %v7326_v14  ;;  %799 = vst [vmem:[#allocation2 + $0x187] sm:$0x1] %v7326_v14  ;;  %v6112_v15 = vld [vmem:[#allocation3 + $0x70] sm:$0xff]  }
  0x3b   :  { %v554_v2 = vpack.c.bf16 %v4651_v63, %v6488_v23  ;;  %v6110_v12 = vld [vmem:[#allocation3 + $0x60] sm:$0xff]   ;;  %800 = vst [vmem:[#allocation2 + $0x19f] sm:$0x1] %v7326_v14  ;;  %801 = vst [vmem:[#allocation2 + $0x1b7] sm:$0x1] %v7326_v14  ;;  %v6113_v16 = vld [vmem:[#allocation3 + $0x78] sm:$0xff]  }
  0x3c   :  { %5153 = vmatmul.mubr.msk.bf16.gmra.mrb[8].mxu1 %vm115_vm0, %v103_v42  ;;  %802 = vst [vmem:[#allocation2 + $0x28] sm:$0x1] %v7326_v14  ;;  %803 = vst [vmem:[#allocation2 + $0x40] sm:$0x1] %v7326_v14  ;;  %v6655_v17 = vld [vmem:[#allocation3] sm:$0xff]   ;;  %v874_v38 = vld [vmem:[#allocation2 + $0x8] sm:$0xff] }
  0x3d   :  { %5156 = vmatprep.mubr.msk.bf16.mxu1 %vm115_vm0, %v104_v44  ;;  %804 = vst [vmem:[#allocation2 + $0x58] sm:$0x1] %v7326_v14  ;;  %805 = vst [vmem:[#allocation2 + $0x70] sm:$0x1] %v7326_v14  ;;  %v6661_v21 = vld [vmem:[%s7320_s2] ss:$0 sm:$0xff] }
  0x3e   :  { %5189 = vmatmul.mubr.msk.bf16.gmra.mrb[8].mxu0 %vm115_vm0, %v386_v45  ;;  %806 = vst [vmem:[#allocation2 + $0x88] sm:$0x1] %v7326_v14  ;;  %807 = vst [vmem:[#allocation2 + $0xa0] sm:$0x1] %v7326_v14 }
  0x3f   :  { %5192 = vmatprep.mubr.msk.bf16.mxu0 %vm115_vm0, %v387_v46  ;;  %808 = vst [vmem:[#allocation2 + $0xb8] sm:$0x1] %v7326_v14  ;;  %809 = vst [vmem:[#allocation2 + $0xd0] sm:$0x1] %v7326_v14 }
  0x40   :  { %810 = vst [vmem:[#allocation2 + $0x118] sm:$0x1] %v7326_v14  ;;  %811 = vst [vmem:[#allocation2 + $0x130] sm:$0x1] %v7326_v14 }
  0x41   :  { %812 = vst [vmem:[#allocation2 + $0x148] sm:$0x1] %v7326_v14  ;;  %813 = vst [vmem:[#allocation2 + $0x160] sm:$0x1] %v7326_v14 }
  0x42   :  { %814 = vst [vmem:[#allocation2 + $0x178] sm:$0x1] %v7326_v14  ;;  %815 = vst [vmem:[#allocation2 + $0x190] sm:$0x1] %v7326_v14 }
  0x43   :  { %816 = vst [vmem:[#allocation2 + $0x1a8] sm:$0x1] %v7326_v14  ;;  %817 = vst [vmem:[#allocation2 + $0x1c0] sm:$0x1] %v7326_v14 }
  0x44   :  { %5157 = vmatmul.mubr.msk.bf16.gmra.mrb[12].mxu1 %vm115_vm0, %v105_v52 }
  0x45   :  { %5162 = vmatprep.mubr.msk.bf16.mxu1 %vm115_vm0, %v72_v53 }
  0x46   :  { %5193 = vmatmul.mubr.msk.bf16.gmra.mrb[12].mxu0 %vm115_vm0, %v388_v54 }
  0x47   :  { %5198 = vmatprep.mubr.msk.bf16.mxu0 %vm115_vm0, %v551_v55 }
  0x4c   :  { %5163 = vmatmul.mubr.msk.bf16.vlgmr.msra.gmra.mrb[0].mxu1 %vm115_vm0, %v73_v56 }
  0x4d   :  { %5166 = vmatprep.mubr.msk.bf16.mxu1 %vm115_vm0, %v74_v58  ;;  %5215 = vmatpush3.bf16.msra.mxu1 %v6106_v40 }
  0x4e   :  { %5199 = vmatmul.mubr.msk.bf16.vlgmr.msra.gmra.mrb[0].mxu0 %vm115_vm0, %v552_v59  ;;  %5216 = vmatprep.subr.bf16.mxu1 %v6107_v57  ;;  %v6115_v59 = vld [vmem:[#allocation3 + $0x8] sm:$0xff]  }
  0x4f   :  { %5202 = vmatprep.mubr.msk.bf16.mxu0 %vm115_vm0, %v553_v60 }
  0x51   :  { %5217 = vmatpush3.bf16.msra.mxu1 %v6107_v57 }
  0x52   :  { %5218 = vmatprep.subr.bf16.mxu1 %v6108_v62 }
  0x54   :  { %5167 = vmatmul.mubr.msk.bf16.gmra.mrb[4].mxu1 %vm115_vm0, %v75_v0 }
  0x55   :  { %5170 = vmatprep.mubr.msk.bf16.mxu1 %vm115_vm0, %v76_v1  ;;  %5219 = vmatpush3.bf16.msra.mxu1 %v6108_v62 }
  0x56   :  { %5203 = vmatmul.mubr.msk.bf16.gmra.mrb[4].mxu0 %vm115_vm0, %v554_v2  ;;  %5220 = vmatprep.subr.bf16.mxu1 %v6109_v11 }
  0x57   :  { %5206 = vmatprep.mubr.msk.bf16.mxu0 %vm115_vm0, %v555_v3 }
  0x59   :  { %5221 = vmatpush3.bf16.msra.mxu1 %v6109_v11 }
  0x5a   :  { %5222 = vmatprep.subr.bf16.mxu1 %v6110_v12 }
  0x5c   :  { %5171 = vmatmul.mubr.msk.bf16.gmra.mrb[8].mxu1 %vm115_vm0, %v77_v4 }
  0x5d   :  { %5174 = vmatprep.mubr.msk.bf16.mxu1 %vm115_vm0, %v78_v5  ;;  %5223 = vmatpush3.bf16.msra.mxu1 %v6110_v12 }
  0x5e   :  { %5207 = vmatmul.mubr.msk.bf16.gmra.mrb[8].mxu0 %vm115_vm0, %v556_v6  ;;  %5224 = vmatprep.subr.bf16.mxu1 %v6111_v13 }
  0x5f   :  { %5210 = vmatprep.mubr.msk.bf16.mxu0 %vm115_vm0, %v557_v7  ;;  %v6116_v7 = vld [vmem:[#allocation3 + $0x10] sm:$0xff]  }
  0x61   :  { %5225 = vmatpush3.bf16.msra.mxu1 %v6111_v13 }
  0x62   :  { %5226 = vmatprep.subr.bf16.mxu1 %v6112_v15 }
  0x64   :  { %5175 = vmatmul.mubr.msk.bf16.gmra.mrb[12].mxu1 %vm115_vm0, %v79_v9 }
  0x65   :  { %5227 = vmatpush3.bf16.msra.mxu1 %v6112_v15 }
  0x66   :  { %5211 = vmatmul.mubr.msk.bf16.gmra.mrb[12].mxu0 %vm115_vm0, %v558_v10  ;;  %5228 = vmatprep.subr.bf16.mxu1 %v6113_v16 }
  0x69   :  { %5229 = vmatpush3.bf16.msra.mxu1 %v6113_v16 }
  0x6a   :  { %5246 = vmatprep.subr.bf16.mxu1 %v6655_v17 }
 0x11f   :  { %v5164_v18 = vpop.f32.mrb[0].mxu1 }
 0x120   :  { %v301_v19 = vpop.f32.mrb[1].mxu1 }
 0x121   :  { %v5200_v20 = vpop.f32.mrb[0].mxu0  ;;  %v5165_v22 = vpop.f32.mrb[2].mxu1 }
 0x122   :  { %v5790_v23 = vadd.f32 %v5200_v20, %v5164_v18  ;;  %v626_v24 = vpop.f32.mrb[1].mxu0  ;;  %v304_v25 = vpop.f32.mrb[3].mxu1 }
 0x123   :  { %v5791_v26 = vadd.f32 %v626_v24, %v301_v19  ;;  %v5201_v27 = vpop.f32.mrb[2].mxu0 }
 0x124   :  { %v714_v28 = vadd.f32 %v5790_v23, %v6661_v21  ;;  %v5792_v29 = vadd.f32 %v5201_v27, %v5165_v22  ;;  %v629_v30 = vpop.f32.mrb[3].mxu0 }
 0x125   :  { %v712_v31 = vadd.f32 %v5791_v26, %v6661_v21  ;;  %v5793_v32 = vadd.f32 %v629_v30, %v304_v25  ;;  %v6117_v26 = vld [vmem:[#allocation3 + $0x18] sm:$0xff]  }
 0x126   :  { %vm730_vm1 = vcmp.ge.f32.partialorder %v714_v28, 0.0  ;;  %v746_v33 = vmul.f32 0.01, %v714_v28  ;;  %v715_v34 = vadd.f32 %v5792_v29, %v6661_v21 }
 0x127   :  { %vm728_vm2 = vcmp.ge.f32.partialorder %v712_v31, 0.0  ;;  %v744_v35 = vmul.f32 0.01, %v712_v31  ;;  %v713_v36 = vadd.f32 %v5793_v32, %v6661_v21  ;;  %v5168_v37 = vpop.f32.mrb[4].mxu1 }
 0x128   :  { %v6667_v39 = vsel %vm730_vm1, %v714_v28, %v746_v33  ;;  %vm731_vm3 = vcmp.ge.f32.partialorder %v715_v34, 0.0  ;;  %v747_v40 = vmul.f32 0.01, %v715_v34  ;;  %v317_v41 = vpop.f32.mrb[5].mxu1 }
 0x129   :  { %820 = vst [vmem:[#allocation2 + $0x50] sm:$0xff] %v6667_v39  ;;  %v6670_v42 = vsel %vm728_vm2, %v712_v31, %v744_v35  ;;  %vm729_vm4 = vcmp.ge.f32.partialorder %v713_v36, 0.0  ;;  %v745_v43 = vmul.f32 0.01, %v713_v36  ;;  %v5204_v44 = vpop.f32.mrb[4].mxu0  ;;  %v5169_v45 = vpop.f32.mrb[6].mxu1 }
 0x12a   :  { %818 = vst [vmem:[#allocation2 + $0x20] sm:$0xff] %v6670_v42  ;;  %v6673_v46 = vsel %vm731_vm3, %v715_v34, %v747_v40  ;;  %v5794_v47 = vadd.f32 %v5204_v44, %v5168_v37  ;;  %v642_v48 = vpop.f32.mrb[5].mxu0  ;;  %v320_v49 = vpop.f32.mrb[7].mxu1  ;;  %v890_v50 = vpack.c.bf16 %v6670_v42, %v874_v38  ;;  %v882_v34 = vld [vmem:[#allocation2 + $0xf8] sm:$0xff]  ;;  %v6118_v40 = vld [vmem:[#allocation3 + $0x20] sm:$0xff]   ;;  %v6139_v35 = vld [vmem:[#allocation3 + $0x108] sm:$0xff]  }
 0x12b   :  { %821 = vst [vmem:[#allocation2 + $0x68] sm:$0xff] %v6673_v46  ;;  %v6677_v51 = vsel %vm729_vm4, %v713_v36, %v745_v43  ;;  %v5795_v52 = vadd.f32 %v642_v48, %v317_v41  ;;  %v5205_v53 = vpop.f32.mrb[6].mxu0 }
 0x12c   :  { %819 = vst [vmem:[#allocation2 + $0x38] sm:$0xff] %v6677_v51  ;;  %v718_v55 = vadd.f32 %v5794_v47, %v6661_v21  ;;  %v5796_v56 = vadd.f32 %v5205_v53, %v5169_v45  ;;  %v645_v57 = vpop.f32.mrb[7].mxu0  ;;  %5230 = vmatprep.mubr.bf16.mxu1 %v890_v50  ;;  %v891_v58 = vpack.c.bf16 %v6667_v39, %v6677_v51 }
 0x12d   :  { %v1625_v60 = vpack.c.bf16 %v6677_v51, %v6670_v42  ;;  %v716_v61 = vadd.f32 %v5795_v52, %v6661_v21  ;;  %v5797_v62 = vadd.f32 %v645_v57, %v320_v49  ;;  %v6149_v42 = vld [vmem:[#allocation3 + $0x158] sm:$0xff]  }
 0x12e   :  { %vm734_vm5 = vcmp.ge.f32.partialorder %v718_v55, 0.0  ;;  %v750_v63 = vmul.f32 0.01, %v718_v55  ;;  %v719_v0 = vadd.f32 %v5796_v56, %v6661_v21  ;;  %5231 = vmatmul.mubr.bf16.vlgmr.msra.gmra.mrb[16].mxu1 %v891_v58 }
 0x12f   :  { %vm732_vm6 = vcmp.ge.f32.partialorder %v716_v61, 0.0  ;;  %v748_v1 = vmul.f32 0.01, %v716_v61  ;;  %v717_v2 = vadd.f32 %v5797_v62, %v6661_v21  ;;  %v5172_v3 = vpop.f32.mrb[8].mxu1  ;;  %5247 = vmatpush3.bf16.msra.mxu1 %v6655_v17 }
 0x130   :  { %v6691_v4 = vsel %vm734_vm5, %v718_v55, %v750_v63  ;;  %vm735_vm7 = vcmp.ge.f32.partialorder %v719_v0, 0.0  ;;  %v751_v5 = vmul.f32 0.01, %v719_v0  ;;  %v333_v6 = vpop.f32.mrb[9].mxu1  ;;  %5248 = vmatprep.subr.bf16.mxu1 %v6115_v59  ;;  %v6119_v63 = vld [vmem:[#allocation3 + $0x28] sm:$0xff]  }
 0x131   :  { %824 = vst [vmem:[#allocation2 + $0xb0] sm:$0xff] %v6691_v4  ;;  %v6694_v8 = vsel %vm732_vm6, %v716_v61, %v748_v1  ;;  %vm733_vm8 = vcmp.ge.f32.partialorder %v717_v2, 0.0  ;;  %v749_v9 = vmul.f32 0.01, %v717_v2  ;;  %v5208_v10 = vpop.f32.mrb[8].mxu0  ;;  %v5173_v11 = vpop.f32.mrb[10].mxu1 }
 0x132   :  { %822 = vst [vmem:[#allocation2 + $0x80] sm:$0xff] %v6694_v8  ;;  %v6697_v12 = vsel %vm735_vm7, %v719_v0, %v751_v5  ;;  %v5798_v13 = vadd.f32 %v5208_v10, %v5172_v3  ;;  %v658_v15 = vpop.f32.mrb[9].mxu0  ;;  %v336_v16 = vpop.f32.mrb[11].mxu1  ;;  %v892_v17 = vpack.c.bf16 %v6694_v8, %v6673_v46 }
 0x133   :  { %825 = vst [vmem:[#allocation2 + $0xc8] sm:$0xff] %v6697_v12  ;;  %v6702_v18 = vsel %vm733_vm8, %v717_v2, %v749_v9  ;;  %v5799_v19 = vadd.f32 %v658_v15, %v333_v6  ;;  %v5209_v20 = vpop.f32.mrb[10].mxu0  ;;  %5249 = vmatpush3.bf16.msra.mxu1 %v6115_v59  ;;  %v7330_v51 = vpack.c.bf16 %v6697_v12, %v6691_v4  ;;  %v6153_v12 = vld [vmem:[#allocation3 + $0x178] sm:$0xff]  }
 0x134   :  { %823 = vst [vmem:[#allocation2 + $0x98] sm:$0xff] %v6702_v18  ;;  %v722_v22 = vadd.f32 %v5798_v13, %v6661_v21  ;;  %v5800_v23 = vadd.f32 %v5209_v20, %v5173_v11  ;;  %v661_v24 = vpop.f32.mrb[11].mxu0  ;;  %5234 = vmatprep.mubr.bf16.mxu1 %v892_v17  ;;  %v893_v25 = vpack.c.bf16 %v6691_v4, %v6702_v18  ;;  %v6120_v11 = vld [vmem:[#allocation3 + $0x30] sm:$0xff]  }
 0x135   :  { %5250 = vmatprep.subr.bf16.mxu1 %v6116_v7  ;;  %v720_v27 = vadd.f32 %v5799_v19, %v6661_v21  ;;  %v5801_v28 = vadd.f32 %v661_v24, %v336_v16  ;;  %v6748_v19 = vld [vmem:[#allocation2 + $0x1f] sm:$0xff]  ;;  %v6152_v4 = vld [vmem:[#allocation3 + $0x170] sm:$0xff]  }
 0x136   :  { %vm738_vm9 = vcmp.ge.f32.partialorder %v722_v22, 0.0  ;;  %v754_v29 = vmul.f32 0.01, %v722_v22  ;;  %v723_v30 = vadd.f32 %v5800_v23, %v6661_v21  ;;  %5235 = vmatmul.mubr.bf16.gmra.mrb[20].mxu1 %v893_v25  ;;  %v6121_v24 = vld [vmem:[#allocation3 + $0x38] sm:$0xff]   ;;  %v850_v25 = vpack.c.bf16 %v6748_v19, %v7326_v14 }
 0x137   :  { %vm736_vm10 = vcmp.ge.f32.partialorder %v720_v27, 0.0  ;;  %v752_v31 = vmul.f32 0.01, %v720_v27  ;;  %v721_v32 = vadd.f32 %v5801_v28, %v6661_v21  ;;  %v5176_v33 = vpop.f32.mrb[12].mxu1  ;;  %5251 = vmatpush3.bf16.msra.mxu1 %v6116_v7  ;;  %v6762_v28 = vld [vmem:[#allocation2 + $0x37] sm:$0xff] }
 0x138   :  { %v6713_v36 = vsel %vm738_vm9, %v722_v22, %v754_v29  ;;  %vm739_vm11 = vcmp.ge.f32.partialorder %v723_v30, 0.0  ;;  %v755_v37 = vmul.f32 0.01, %v723_v30  ;;  %v349_v38 = vpop.f32.mrb[13].mxu1  ;;  %5252 = vmatprep.subr.bf16.mxu1 %v6117_v26  ;;  %v6137_v7 = vld [vmem:[#allocation3 + $0xf8] sm:$0xff]   ;;  %v1423_v41 = vpack.c.bf16 %v6762_v28, %v6748_v19  ;;  %v6140_v19 = vld [vmem:[#allocation3 + $0x110] sm:$0xff]  }
 0x139   :  { %828 = vst [vmem:[#allocation2 + $0x140] sm:$0xff] %v6713_v36  ;;  %v6718_v43 = vsel %vm736_vm10, %v720_v27, %v752_v31  ;;  %vm737_vm12 = vcmp.ge.f32.partialorder %v721_v32, 0.0  ;;  %v753_v44 = vmul.f32 0.01, %v721_v32  ;;  %v5212_v45 = vpop.f32.mrb[12].mxu0  ;;  %v5177_v47 = vpop.f32.mrb[14].mxu1 }
 0x13a   :  { %826 = vst [vmem:[#allocation2 + $0x110] sm:$0xff] %v6718_v43  ;;  %v6721_v48 = vsel %vm739_vm11, %v723_v30, %v755_v37  ;;  %v5802_v49 = vadd.f32 %v5212_v45, %v5176_v33  ;;  %v674_v50 = vpop.f32.mrb[13].mxu0  ;;  %v352_v52 = vpop.f32.mrb[15].mxu1  ;;  %v894_v53 = vpack.c.bf16 %v6718_v43, %v882_v34  ;;  %v6122_v27 = vld [vmem:[#allocation3 + $0x80] sm:$0xff]   ;;  %v6766_v30 = vld [vmem:[#allocation2 + $0x4f] sm:$0xff] }
 0x13b   :  { %829 = vst [vmem:[#allocation2 + $0x158] sm:$0xff] %v6721_v48  ;;  %v6725_v55 = vsel %vm737_vm12, %v721_v32, %v753_v44  ;;  %v5803_v56 = vadd.f32 %v674_v50, %v349_v38  ;;  %v5213_v57 = vpop.f32.mrb[14].mxu0  ;;  %5253 = vmatpush3.bf16.msra.mxu1 %v6117_v26  ;;  %v6764_v29 = vld [vmem:[#allocation2 + $0x7f] sm:$0xff]  ;;  %v6770_v31 = vpack.c.bf16 %v6766_v30, %v6762_v28  ;;  %v6772_v32 = vld [vmem:[#allocation2 + $0x67] sm:$0xff]  ;;  %v6124_v37 = vld [vmem:[#allocation3 + $0x90] sm:$0xff]  }
 0x13c   :  { %827 = vst [vmem:[#allocation2 + $0x128] sm:$0xff] %v6725_v55  ;;  %v726_v58 = vadd.f32 %v5802_v49, %v6661_v21  ;;  %v5804_v59 = vadd.f32 %v5213_v57, %v5177_v47  ;;  %v677_v61 = vpop.f32.mrb[15].mxu0  ;;  %5238 = vmatprep.mubr.bf16.mxu1 %v894_v53  ;;  %v895_v62 = vpack.c.bf16 %v6713_v36, %v6725_v55  ;;  %v6123_v33 = vld [vmem:[#allocation3 + $0x88] sm:$0xff]   ;;  %v6780_v38 = vld [vmem:[#allocation2 + $0x97] sm:$0xff]  ;;  %v6126_v50 = vld [vmem:[#allocation3 + $0xa0] sm:$0xff]  }
 0x13d   :  { %5254 = vmatprep.subr.bf16.mxu1 %v6118_v40  ;;  %v724_v0 = vadd.f32 %v5803_v56, %v6661_v21  ;;  %v5805_v1 = vadd.f32 %v677_v61, %v352_v52  ;;  %v6776_v34 = vpack.c.bf16 %v6764_v29, %v6772_v32  ;;  %v6784_v44 = vld [vmem:[#allocation2 + $0xaf] sm:$0xff]  ;;  %v6125_v47 = vld [vmem:[#allocation3 + $0x98] sm:$0xff]   ;;  %v1425_v54 = vpack.c.bf16 %v6780_v38, %v6764_v29  ;;  %v6886_v28 = vld [vmem:[#allocation2 + $0xc7] sm:$0xff] }
 0x13e   :  { %vm742_vm13 = vcmp.ge.f32.partialorder %v726_v58, 0.0  ;;  %v758_v2 = vmul.f32 0.01, %v726_v58  ;;  %v727_v3 = vadd.f32 %v5804_v59, %v6661_v21  ;;  %5239 = vmatmul.mubr.bf16.gmra.mrb[24].mxu1 %v895_v62  ;;  %v6788_v45 = vpack.c.bf16 %v6784_v44, %v6780_v38  ;;  %v6127_v59 = vld [vmem:[#allocation3 + $0xa8] sm:$0xff]   ;;  %v6128_v62 = vld [vmem:[#allocation3 + $0xb0] sm:$0xff]   ;;  %v6142_v29 = vld [vmem:[#allocation3 + $0x120] sm:$0xff]  }
 0x13f   :  { %vm740_vm14 = vcmp.ge.f32.partialorder %v724_v0, 0.0  ;;  %v756_v5 = vmul.f32 0.01, %v724_v0  ;;  %v725_v6 = vadd.f32 %v5805_v1, %v6661_v21  ;;  %5255 = vmatpush3.bf16.msra.mxu1 %v6118_v40  ;;  %v6813_v1 = vld [vmem:[#allocation2 + $0x21] sm:$0xff]  ;;  %v6144_v38 = vld [vmem:[#allocation3 + $0x130] sm:$0xff]  }
 0x140   :  { %v6736_v9 = vsel %vm742_vm13, %v726_v58, %v758_v2  ;;  %vm743_vm15 = vcmp.ge.f32.partialorder %v727_v3, 0.0  ;;  %v759_v10 = vmul.f32 0.01, %v727_v3  ;;  %5256 = vmatprep.subr.bf16.mxu1 %v6119_v63  ;;  %v6797_v56 = vld [vmem:[#allocation2 + $0x13f] sm:$0xff] }
 0x141   :  { %832 = vst [vmem:[#allocation2 + $0x1a0] sm:$0xff] %v6736_v9  ;;  %v6741_v15 = vsel %vm740_vm14, %v724_v0, %v756_v5  ;;  %vm741_vm0 = vcmp.ge.f32.partialorder %v725_v6, 0.0  ;;  %v757_v16 = vmul.f32 0.01, %v725_v6  ;;  %v6782_v40 = vld [vmem:[#allocation2 + $0x10f] sm:$0xff]  ;;  %v6129_v5 = vld [vmem:[#allocation3 + $0xb8] sm:$0xff]  }
 0x142   :  { %830 = vst [vmem:[#allocation2 + $0x170] sm:$0xff] %v6741_v15  ;;  %v6744_v21 = vsel %vm743_vm15, %v727_v3, %v759_v10  ;;  %v896_v17 = vpack.c.bf16 %v6741_v15, %v6721_v48  ;;  %v854_v49 = vpack.c.bf16 %v6782_v40, %v7326_v14  ;;  %v6803_v58 = vld [vmem:[#allocation2 + $0x157] sm:$0xff]  ;;  %v1205_v0 = vld [vmem:[#allocation2 + $0x9] sm:$0xff]  ;;  %v6130_v10 = vld [vmem:[#allocation3 + $0xc0] sm:$0xff]  }
 0x143   :  { %833 = vst [vmem:[#allocation2 + $0x1b8] sm:$0xff] %v6744_v21  ;;  %v6751_v20 = vsel %vm741_vm0, %v725_v6, %v757_v16  ;;  %5257 = vmatpush3.bf16.msra.mxu1 %v6119_v63  ;;  %v6793_v52 = vld [vmem:[#allocation2 + $0x127] sm:$0xff]  ;;  %v1221_v6 = vpack.c.bf16 %v6813_v1, %v1205_v0  ;;  %v6863_v22 = vld [vmem:[#allocation2 + $0x159] sm:$0xff] }
 0x144   :  { %831 = vst [vmem:[#allocation2 + $0x188] sm:$0xff] %v6751_v20  ;;  %5242 = vmatprep.mubr.bf16.mxu1 %v896_v17  ;;  %v897_v23 = vpack.c.bf16 %v6736_v9, %v6751_v20  ;;  %5258 = vmatprep.subr.bf16.mxu1 %v6120_v11  ;;  %v6801_v57 = vpack.c.bf16 %v6797_v56, %v6793_v52  ;;  %v6825_v16 = vld [vmem:[#allocation2 + $0x81] sm:$0xff]  ;;  %v6827_v17 = vld [vmem:[#allocation2 + $0x51] sm:$0xff] }
 0x146   :  { %5243 = vmatmul.mubr.bf16.gmra.mrb[28].mxu1 %v897_v23 }
 0x147   :  { %5259 = vmatpush3.bf16.msra.mxu1 %v6120_v11  ;;  %5262 = vmatprep.mubr.bf16.mxu1 %v850_v25  ;;  %v6823_v11 = vld [vmem:[#allocation2 + $0x39] sm:$0xff]  ;;  %v6131_v25 = vld [vmem:[#allocation3 + $0xc8] sm:$0xff]  }
 0x148   :  { %5260 = vmatprep.subr.bf16.mxu1 %v6121_v24  ;;  %v6815_v2 = vld [vmem:[#allocation2 + $0x19f] sm:$0xff]  ;;  %v6831_v23 = vpack.c.bf16 %v6827_v17, %v6823_v11 }
 0x149   :  { %v6795_v53 = vld [vmem:[#allocation2 + $0x16f] sm:$0xff]  ;;  %v6873_v26 = vld [vmem:[#allocation2 + $0x1a1] sm:$0xff] }
 0x14a   :  { %v6807_v61 = vpack.c.bf16 %v6795_v53, %v6803_v58 }
 0x14b   :  { %5261 = vmatpush3.bf16.msra.mxu1 %v6121_v24  ;;  %v6811_v63 = vld [vmem:[#allocation2 + $0x187] sm:$0xff] }
 0x14c   :  { %5278 = vmatprep.subr.bf16.mxu1 %v6122_v27  ;;  %v6819_v3 = vpack.c.bf16 %v6815_v2, %v6811_v63  ;;  %v6833_v24 = vld [vmem:[#allocation2 + $0x69] sm:$0xff] }
 0x14e   :  { %5263 = vmatmul.mubr.bf16.vlgmr.msra.gmra.mrb[16].mxu1 %v6770_v31 }
 0x14f   :  { %5266 = vmatprep.mubr.bf16.mxu1 %v6776_v34  ;;  %5279 = vmatpush3.bf16.msra.mxu1 %v6122_v27  ;;  %v6837_v27 = vpack.c.bf16 %v6825_v16, %v6833_v24 }
 0x150   :  { %5280 = vmatprep.subr.bf16.mxu1 %v6123_v33 }
 0x153   :  { %5281 = vmatpush3.bf16.msra.mxu1 %v6123_v33  ;;  %v6132_v33 = vld [vmem:[#allocation3 + $0xd0] sm:$0xff]  }
 0x154   :  { %5282 = vmatprep.subr.bf16.mxu1 %v6124_v37 }
 0x156   :  { %5267 = vmatmul.mubr.bf16.gmra.mrb[20].mxu1 %v6788_v45 }
 0x157   :  { %5270 = vmatprep.mubr.bf16.mxu1 %v854_v49  ;;  %5283 = vmatpush3.bf16.msra.mxu1 %v6124_v37  ;;  %v6841_v37 = vld [vmem:[#allocation2 + $0x99] sm:$0xff]  ;;  %v6843_v49 = vld [vmem:[#allocation2 + $0x111] sm:$0xff] }
 0x158   :  { %5284 = vmatprep.subr.bf16.mxu1 %v6125_v47 }
 0x15b   :  { %5285 = vmatpush3.bf16.msra.mxu1 %v6125_v47  ;;  %v1213_v47 = vld [vmem:[#allocation2 + $0xf9] sm:$0xff] }
 0x15c   :  { %5286 = vmatprep.subr.bf16.mxu1 %v6126_v50  ;;  %v1225_v0 = vpack.c.bf16 %v6843_v49, %v1213_v47  ;;  %v6135_v47 = vld [vmem:[#allocation3 + $0xe8] sm:$0xff]  }
 0x15e   :  { %5271 = vmatmul.mubr.bf16.gmra.mrb[24].mxu1 %v6801_v57 }
 0x15f   :  { %5274 = vmatprep.mubr.bf16.mxu1 %v6807_v61  ;;  %5287 = vmatpush3.bf16.msra.mxu1 %v6126_v50  ;;  %v6845_v50 = vld [vmem:[#allocation2 + $0xb1] sm:$0xff] }
 0x160   :  { %5288 = vmatprep.subr.bf16.mxu1 %v6127_v59 }
 0x163   :  { %5289 = vmatpush3.bf16.msra.mxu1 %v6127_v59  ;;  %v6849_v59 = vpack.c.bf16 %v6845_v50, %v6841_v37 }
 0x164   :  { %5290 = vmatprep.subr.bf16.mxu1 %v6128_v62 }
 0x166   :  { %5275 = vmatmul.mubr.bf16.gmra.mrb[28].mxu1 %v6819_v3 }
 0x167   :  { %5291 = vmatpush3.bf16.msra.mxu1 %v6128_v62  ;;  %5294 = vmatprep.mubr.bf16.mxu1 %v1221_v6  ;;  %v6133_v62 = vld [vmem:[#allocation3 + $0xd8] sm:$0xff]   ;;  %v6853_v6 = vld [vmem:[#allocation2 + $0x129] sm:$0xff] }
 0x168   :  { %5292 = vmatprep.subr.bf16.mxu1 %v6129_v5 }
 0x16b   :  { %5293 = vmatpush3.bf16.msra.mxu1 %v6129_v5  ;;  %v6134_v5 = vld [vmem:[#allocation3 + $0xe0] sm:$0xff]  }
 0x16c   :  { %5310 = vmatprep.subr.bf16.mxu1 %v6130_v10 }
 0x16e   :  { %5295 = vmatmul.mubr.bf16.vlgmr.msra.gmra.mrb[16].mxu1 %v6831_v23 }
 0x16f   :  { %5298 = vmatprep.mubr.bf16.mxu1 %v6837_v27  ;;  %5311 = vmatpush3.bf16.msra.mxu1 %v6130_v10  ;;  %v6855_v10 = vld [vmem:[#allocation2 + $0x171] sm:$0xff] }
 0x170   :  { %5312 = vmatprep.subr.bf16.mxu1 %v6131_v25 }
 0x173   :  { %5313 = vmatpush3.bf16.msra.mxu1 %v6131_v25  ;;  %v6857_v25 = vld [vmem:[#allocation2 + $0x141] sm:$0xff] }
 0x174   :  { %5314 = vmatprep.subr.bf16.mxu1 %v6132_v33  ;;  %v6861_v14 = vpack.c.bf16 %v6857_v25, %v6853_v6 }
 0x176   :  { %5299 = vmatmul.mubr.bf16.gmra.mrb[20].mxu1 %v6849_v59 }
 0x177   :  { %5302 = vmatprep.mubr.bf16.mxu1 %v1225_v0  ;;  %5315 = vmatpush3.bf16.msra.mxu1 %v6132_v33  ;;  %v6867_v33 = vpack.c.bf16 %v6855_v10, %v6863_v22  ;;  %v6871_v0 = vld [vmem:[#allocation2 + $0x189] sm:$0xff] }
 0x178   :  { %5316 = vmatprep.subr.bf16.mxu1 %v6133_v62  ;;  %v6877_v13 = vpack.c.bf16 %v6873_v26, %v6871_v0 }
 0x17b   :  { %5317 = vmatpush3.bf16.msra.mxu1 %v6133_v62  ;;  %v6136_v62 = vld [vmem:[#allocation3 + $0xf0] sm:$0xff]  }
 0x17c   :  { %5318 = vmatprep.subr.bf16.mxu1 %v6134_v5 }
 0x17e   :  { %5303 = vmatmul.mubr.bf16.gmra.mrb[24].mxu1 %v6861_v14 }
 0x17f   :  { %5306 = vmatprep.mubr.bf16.mxu1 %v6867_v33  ;;  %5319 = vmatpush3.bf16.msra.mxu1 %v6134_v5  ;;  %v6138_v5 = vld [vmem:[#allocation3 + $0x100] sm:$0xff]  }
 0x180   :  { %5320 = vmatprep.subr.bf16.mxu1 %v6135_v47 }
 0x183   :  { %5321 = vmatpush3.bf16.msra.mxu1 %v6135_v47  ;;  %v1424_v47 = vpack.c.bf16 %v6772_v32, %v6766_v30  ;;  %v1427_v30 = vpack.c.bf16 %v6793_v52, %v6782_v40  ;;  %v6143_v32 = vld [vmem:[#allocation3 + $0x128] sm:$0xff]   ;;  %v6896_v40 = vld [vmem:[#allocation2 + $0x1b7] sm:$0xff] }
 0x184   :  { %5322 = vmatprep.subr.bf16.mxu1 %v6136_v62  ;;  %v6145_v52 = vld [vmem:[#allocation3 + $0x138] sm:$0xff]  }
 0x186   :  { %5307 = vmatmul.mubr.bf16.gmra.mrb[28].mxu1 %v6877_v13 }
 0x187   :  { %5323 = vmatpush3.bf16.msra.mxu1 %v6136_v62  ;;  %5326 = vmatprep.mubr.bf16.mxu1 %v1423_v41  ;;  %v1426_v41 = vpack.c.bf16 %v6886_v28, %v6784_v44  ;;  %v1430_v44 = vpack.c.bf16 %v6896_v40, %v6815_v2  ;;  %v6148_v2 = vld [vmem:[#allocation3 + $0x150] sm:$0xff]   ;;  %v6178_v62 = vld [vmem:[#allocation6 + $0x40] sm:$0xff]  }
 0x188   :  { %5324 = vmatprep.subr.bf16.mxu1 %v6137_v7  ;;  %5502 = vmatprep.subr.bf16.mxu0 %v6178_v62 }
 0x189   :  { %5503 = vmatpush3.bf16.msra.mxu0 %v6178_v62 }
 0x18b   :  { %5325 = vmatpush3.bf16.msra.mxu1 %v6137_v7  ;;  %v6141_v7 = vld [vmem:[#allocation3 + $0x118] sm:$0xff]  }
 0x18c   :  { %5342 = vmatprep.subr.bf16.mxu1 %v6138_v5 }
 0x18e   :  { %5327 = vmatmul.mubr.bf16.vlgmr.msra.gmra.mrb[16].mxu1 %v1424_v47  ;;  %v1832_v47 = vpack.c.bf16 %v6863_v22, %v6857_v25  ;;  %v6162_v22 = vld [vmem:[#allocation3 + $0x1c0] sm:$0xff]   ;;  %v6164_v25 = vld [vmem:[#allocation3 + $0x1d0] sm:$0xff]  }
 0x18f   :  { %5330 = vmatprep.mubr.bf16.mxu1 %v1425_v54  ;;  %5343 = vmatpush3.bf16.msra.mxu1 %v6138_v5  ;;  %v1428_v54 = vpack.c.bf16 %v6803_v58, %v6797_v56  ;;  %v6147_v56 = vld [vmem:[#allocation3 + $0x148] sm:$0xff]   ;;  %v7328_v58 = vpack.c.bf16 %v6673_v46, %v6667_v39  ;;  %v6150_v39 = vld [vmem:[#allocation3 + $0x160] sm:$0xff]  }
 0x190   :  { %5344 = vmatprep.subr.bf16.mxu1 %v6139_v35  ;;  %v6151_v46 = vld [vmem:[#allocation3 + $0x168] sm:$0xff]  }
 0x191   :  { %v6930_v5 = vld [vmem:[#allocation2 + $0xc9] sm:$0xff] }
 0x193   :  { %5345 = vmatpush3.bf16.msra.mxu1 %v6139_v35  ;;  %v1429_v35 = vpack.c.bf16 %v6811_v63, %v6795_v53  ;;  %v6146_v53 = vld [vmem:[#allocation3 + $0x140] sm:$0xff]   ;;  %v7329_v63 = vpack.c.bf16 %v6702_v18, %v6694_v8  ;;  %v7332_v8 = vpack.c.bf16 %v6721_v48, %v6713_v36  ;;  %v7333_v18 = vpack.c.bf16 %v6751_v20, %v6741_v15  ;;  %v6179_v36 = vld [vmem:[#allocation6 + $0x48] sm:$0xff]   ;;  %v6180_v15 = vld [vmem:[#allocation6 + $0x50] sm:$0xff]  }
 0x194   :  { %5346 = vmatprep.subr.bf16.mxu1 %v6140_v19  ;;  %v6154_v48 = vld [vmem:[#allocation3 + $0x180] sm:$0xff]   ;;  %5504 = vmatprep.subr.bf16.mxu0 %v6179_v36  ;;  %v1828_v20 = vpack.c.bf16 %v6833_v24, %v6827_v17  ;;  %v1830_v17 = vpack.c.bf16 %v6930_v5, %v6845_v50  ;;  %v6157_v24 = vld [vmem:[#allocation3 + $0x198] sm:$0xff]   ;;  %v1833_v50 = vpack.c.bf16 %v6871_v0, %v6855_v10  ;;  %v6163_v10 = vld [vmem:[#allocation3 + $0x1c8] sm:$0xff]  }
 0x195   :  { %5505 = vmatpush3.bf16.msra.mxu0 %v6179_v36  ;;  %v6176_v36 = vld [vmem:[#allocation3 + $0x230] sm:$0xff]  }
 0x196   :  { %5331 = vmatmul.mubr.bf16.gmra.mrb[20].mxu1 %v1426_v41  ;;  %5506 = vmatprep.subr.bf16.mxu0 %v6180_v15 }
 0x197   :  { %5334 = vmatprep.mubr.bf16.mxu1 %v1427_v30  ;;  %5347 = vmatpush3.bf16.msra.mxu1 %v6140_v19  ;;  %v6159_v19 = vld [vmem:[#allocation3 + $0x1a8] sm:$0xff]   ;;  %v6165_v30 = vld [vmem:[#allocation3 + $0x1d8] sm:$0xff]  }
 0x198   :  { %5348 = vmatprep.subr.bf16.mxu1 %v6141_v7 }
 0x199   :  { %5507 = vmatpush3.bf16.msra.mxu0 %v6180_v15  ;;  %v2231_v15 = vld [vmem:[#allocation2 + $0x1d0] sm:$0xff] }
 0x19b   :  { %5349 = vmatpush3.bf16.msra.mxu1 %v6141_v7  ;;  %v6161_v7 = vld [vmem:[#allocation3 + $0x1b8] sm:$0xff]  }
 0x19c   :  { %5350 = vmatprep.subr.bf16.mxu1 %v6142_v29 }
 0x19e   :  { %5335 = vmatmul.mubr.bf16.gmra.mrb[24].mxu1 %v1428_v54  ;;  %v6169_v54 = vld [vmem:[#allocation3 + $0x1f8] sm:$0xff]  }
 0x19f   :  { %5338 = vmatprep.mubr.bf16.mxu1 %v1429_v35  ;;  %5351 = vmatpush3.bf16.msra.mxu1 %v6142_v29  ;;  %v2216_v29 = vld [vmem:[#allocation2 + $0x38] sm:$0xff]  ;;  %v6170_v35 = vld [vmem:[#allocation3 + $0x200] sm:$0xff]  }
 0x1a0   :  { %5352 = vmatprep.subr.bf16.mxu1 %v6143_v32 }
 0x1a3   :  { %5353 = vmatpush3.bf16.msra.mxu1 %v6143_v32 }
 0x1a4   :  { %5354 = vmatprep.subr.bf16.mxu1 %v6144_v38 }
 0x1a6   :  { %5339 = vmatmul.mubr.bf16.gmra.mrb[28].mxu1 %v1430_v44 }
 0x1a7   :  { %5355 = vmatpush3.bf16.msra.mxu1 %v6144_v38  ;;  %5358 = vmatprep.mubr.bf16.mxu1 %v1625_v60  ;;  %v7331_v60 = vpack.c.bf16 %v6725_v55, %v6718_v43  ;;  %v1827_v43 = vpack.c.bf16 %v6823_v11, %v6813_v1  ;;  %v7334_v55 = vpack.c.bf16 %v6744_v21, %v6736_v9  ;;  %v6155_v1 = vld [vmem:[#allocation3 + $0x188] sm:$0xff]   ;;  %v6181_v21 = vld [vmem:[#allocation6 + $0x58] sm:$0xff]   ;;  %v6156_v11 = vld [vmem:[#allocation3 + $0x190] sm:$0xff]  }
 0x1a8   :  { %5356 = vmatprep.subr.bf16.mxu1 %v6145_v52  ;;  %v1829_v9 = vpack.c.bf16 %v6841_v37, %v6825_v16  ;;  %5508 = vmatprep.subr.bf16.mxu0 %v6181_v21  ;;  %v1831_v16 = vpack.c.bf16 %v6853_v6, %v6843_v49  ;;  %v6158_v37 = vld [vmem:[#allocation3 + $0x1a0] sm:$0xff]   ;;  %v6160_v49 = vld [vmem:[#allocation3 + $0x1b0] sm:$0xff]   ;;  %v2220_v38 = vld [vmem:[#allocation2 + $0x98] sm:$0xff] }
 0x1a9   :  { %5509 = vmatpush3.bf16.msra.mxu0 %v6181_v21  ;;  %v6940_v6 = vld [vmem:[#allocation2 + $0x1b9] sm:$0xff] }
 0x1aa   :  { %v1834_v41 = vpack.c.bf16 %v6940_v6, %v6873_v26  ;;  %v7335_v26 = vmov 0.0  }
 0x1ab   :  { %5357 = vmatpush3.bf16.msra.mxu1 %v6145_v52  ;;  %v2033_v0 = vpack.c.bf16 %v7335_v26, %v6886_v28  ;;  %v2037_v28 = vpack.c.bf16 %v7335_v26, %v6896_v40  ;;  %v2221_v52 = vld [vmem:[#allocation2 + $0xb0] sm:$0xff] }
 0x1ac   :  { %5374 = vmatprep.subr.bf16.mxu1 %v6146_v53  ;;  %v6172_v40 = vld [vmem:[#allocation3 + $0x210] sm:$0xff]  }
 0x1ae   :  { %5359 = vmatmul.mubr.bf16.vlgmr.msra.gmra.mrb[16].mxu1 %v7328_v58  ;;  %v2222_v58 = vld [vmem:[#allocation2 + $0xc8] sm:$0xff] }
 0x1af   :  { %5362 = vmatprep.mubr.bf16.mxu1 %v7329_v63  ;;  %5375 = vmatpush3.bf16.msra.mxu1 %v6146_v53  ;;  %v6171_v53 = vld [vmem:[#allocation3 + $0x208] sm:$0xff]   ;;  %v2223_v63 = vld [vmem:[#allocation2 + $0xe0] sm:$0xff] }
 0x1b0   :  { %5376 = vmatprep.subr.bf16.mxu1 %v6147_v56 }
 0x1b3   :  { %5377 = vmatpush3.bf16.msra.mxu1 %v6147_v56  ;;  %v2234_v56 = vpack.c.bf16 %v2221_v52, %v2220_v38 }
 0x1b4   :  { %5378 = vmatprep.subr.bf16.mxu1 %v6148_v2 }
 0x1b6   :  { %5363 = vmatmul.mubr.bf16.gmra.mrb[20].mxu1 %v7330_v51  ;;  %v2225_v51 = vld [vmem:[#allocation2 + $0x140] sm:$0xff] }
 0x1b7   :  { %5366 = vmatprep.mubr.bf16.mxu1 %v7331_v60  ;;  %5379 = vmatpush3.bf16.msra.mxu1 %v6148_v2  ;;  %v2224_v2 = vld [vmem:[#allocation2 + $0x128] sm:$0xff]  ;;  %v6173_v60 = vld [vmem:[#allocation3 + $0x218] sm:$0xff]  }
 0x1b8   :  { %5380 = vmatprep.subr.bf16.mxu1 %v6149_v42 }
 0x1bb   :  { %5381 = vmatpush3.bf16.msra.mxu1 %v6149_v42  ;;  %v2235_v42 = vpack.c.bf16 %v2223_v63, %v2222_v58  ;;  %v6188_v58 = vld [vmem:[#allocation6 + $0x10] sm:$0xff]  }
 0x1bc   :  { %5382 = vmatprep.subr.bf16.mxu1 %v6150_v39 }
 0x1be   :  { %5367 = vmatmul.mubr.bf16.gmra.mrb[24].mxu1 %v7332_v8  ;;  %v2227_v8 = vld [vmem:[#allocation2 + $0x170] sm:$0xff] }
 0x1bf   :  { %5370 = vmatprep.mubr.bf16.mxu1 %v7333_v18  ;;  %5383 = vmatpush3.bf16.msra.mxu1 %v6150_v39  ;;  %v2236_v39 = vpack.c.bf16 %v2225_v51, %v2224_v2  ;;  %v2228_v18 = vld [vmem:[#allocation2 + $0x188] sm:$0xff] }
 0x1c0   :  { %5384 = vmatprep.subr.bf16.mxu1 %v6151_v46 }
 0x1c3   :  { %5385 = vmatpush3.bf16.msra.mxu1 %v6151_v46  ;;  %v6174_v46 = vld [vmem:[#allocation3 + $0x220] sm:$0xff]  }
 0x1c4   :  { %5386 = vmatprep.subr.bf16.mxu1 %v6152_v4 }
 0x1c6   :  { %5371 = vmatmul.mubr.bf16.gmra.mrb[28].mxu1 %v7334_v55  ;;  %v6175_v55 = vld [vmem:[#allocation3 + $0x228] sm:$0xff]  }
 0x1c7   :  { %5387 = vmatpush3.bf16.msra.mxu1 %v6152_v4  ;;  %5390 = vmatprep.mubr.bf16.mxu1 %v1827_v43  ;;  %v2226_v4 = vld [vmem:[#allocation2 + $0x158] sm:$0xff]  ;;  %v2229_v43 = vld [vmem:[#allocation2 + $0x1a0] sm:$0xff] }
 0x1c8   :  { %5388 = vmatprep.subr.bf16.mxu1 %v6153_v12  ;;  %v2238_v62 = vpack.c.bf16 %v2229_v43, %v2228_v18 }
 0x1cb   :  { %5389 = vmatpush3.bf16.msra.mxu1 %v6153_v12  ;;  %v2237_v12 = vpack.c.bf16 %v2227_v8, %v2226_v4 }
 0x1cc   :  { %5406 = vmatprep.subr.bf16.mxu1 %v6154_v48 }
 0x1ce   :  { %5391 = vmatmul.mubr.bf16.vlgmr.msra.gmra.mrb[16].mxu1 %v1828_v20 }
 0x1cf   :  { %5394 = vmatprep.mubr.bf16.mxu1 %v1829_v9  ;;  %5407 = vmatpush3.bf16.msra.mxu1 %v6154_v48  ;;  %v2230_v48 = vld [vmem:[#allocation2 + $0x1b8] sm:$0xff]  ;;  %v2425_v9 = vld [vmem:[#allocation2 + $0xe1] sm:$0xff] }
 0x1d0   :  { %5408 = vmatprep.subr.bf16.mxu1 %v6155_v1  ;;  %v2239_v20 = vpack.c.bf16 %v2231_v15, %v2230_v48  ;;  %v2437_v21 = vpack.c.bf16 %v2425_v9, %v6930_v5 }
 0x1d3   :  { %5409 = vmatpush3.bf16.msra.mxu1 %v6155_v1  ;;  %v6177_v1 = vld [vmem:[#allocation3 + $0x238] sm:$0xff]  }
 0x1d4   :  { %5410 = vmatprep.subr.bf16.mxu1 %v6156_v11 }
 0x1d6   :  { %5395 = vmatmul.mubr.bf16.gmra.mrb[20].mxu1 %v1830_v17 }
 0x1d7   :  { %5398 = vmatprep.mubr.bf16.mxu1 %v1831_v16  ;;  %5411 = vmatpush3.bf16.msra.mxu1 %v6156_v11  ;;  %v2433_v11 = vld [vmem:[#allocation2 + $0x1d1] sm:$0xff] }
 0x1d8   :  { %5412 = vmatprep.subr.bf16.mxu1 %v6157_v24  ;;  %v2441_v17 = vpack.c.bf16 %v2433_v11, %v6940_v6 }
 0x1db   :  { %5413 = vmatpush3.bf16.msra.mxu1 %v6157_v24  ;;  %v6183_v24 = vld [vmem:[#allocation6 + $0x68] sm:$0xff]  }
 0x1dc   :  { %5414 = vmatprep.subr.bf16.mxu1 %v6158_v37 }
 0x1de   :  { %5399 = vmatmul.mubr.bf16.gmra.mrb[24].mxu1 %v1832_v47 }
 0x1df   :  { %5402 = vmatprep.mubr.bf16.mxu1 %v1833_v50  ;;  %5415 = vmatpush3.bf16.msra.mxu1 %v6158_v37 }
 0x1e0   :  { %5416 = vmatprep.subr.bf16.mxu1 %v6159_v19 }
 0x1e3   :  { %5417 = vmatpush3.bf16.msra.mxu1 %v6159_v19 }
 0x1e4   :  { %5418 = vmatprep.subr.bf16.mxu1 %v6160_v49 }
 0x1e6   :  { %5403 = vmatmul.mubr.bf16.gmra.mrb[28].mxu1 %v1834_v41 }
 0x1e7   :  { %5419 = vmatpush3.bf16.msra.mxu1 %v6160_v49  ;;  %5422 = vmatprep.mubr.bf16.mxu1 %v6770_v31  ;;  %v6166_v31 = vld [vmem:[#allocation3 + $0x1e0] sm:$0xff]  }
 0x1e8   :  { %5420 = vmatprep.subr.bf16.mxu1 %v6161_v7 }
 0x1eb   :  { %5421 = vmatpush3.bf16.msra.mxu1 %v6161_v7  ;;  %v2747_v7 = vld [vmem:[#allocation2 + $0x8] sm:$0xff] }
 0x1ec   :  { %5438 = vmatprep.subr.bf16.mxu1 %v6162_v22 }
 0x1ee   :  { %5423 = vmatmul.mubr.bf16.vlgmr.msra.gmra.mrb[16].mxu1 %v6776_v34  ;;  %v6167_v34 = vld [vmem:[#allocation3 + $0x1e8] sm:$0xff]  }
 0x1ef   :  { %5426 = vmatprep.mubr.bf16.mxu1 %v6788_v45  ;;  %5439 = vmatpush3.bf16.msra.mxu1 %v6162_v22  ;;  %v6168_v45 = vld [vmem:[#allocation3 + $0x1f0] sm:$0xff]  }
 0x1f0   :  { %5440 = vmatprep.subr.bf16.mxu1 %v6163_v10 }
 0x1f3   :  { %5441 = vmatpush3.bf16.msra.mxu1 %v6163_v10 }
 0x1f4   :  { %5442 = vmatprep.subr.bf16.mxu1 %v6164_v25 }
 0x1f6   :  { %5427 = vmatmul.mubr.bf16.gmra.mrb[20].mxu1 %v2033_v0 }
 0x1f7   :  { %5430 = vmatprep.mubr.bf16.mxu1 %v6801_v57  ;;  %5443 = vmatpush3.bf16.msra.mxu1 %v6164_v25  ;;  %v2217_v57 = vld [vmem:[#allocation2 + $0x50] sm:$0xff] }
 0x1f8   :  { %5444 = vmatprep.subr.bf16.mxu1 %v6165_v30  ;;  %v2232_v32 = vpack.c.bf16 %v2217_v57, %v2216_v29 }
 0x1fb   :  { %5445 = vmatpush3.bf16.msra.mxu1 %v6165_v30 }
 0x1fc   :  { %5446 = vmatprep.subr.bf16.mxu1 %v6166_v31 }
 0x1fe   :  { %5431 = vmatmul.mubr.bf16.gmra.mrb[24].mxu1 %v6807_v61  ;;  %v2219_v61 = vld [vmem:[#allocation2 + $0x80] sm:$0xff] }
 0x1ff   :  { %5434 = vmatprep.mubr.bf16.mxu1 %v6819_v3  ;;  %5447 = vmatpush3.bf16.msra.mxu1 %v6166_v31  ;;  %v2218_v3 = vld [vmem:[#allocation2 + $0x68] sm:$0xff] }
 0x200   :  { %5448 = vmatprep.subr.bf16.mxu1 %v6167_v34  ;;  %v2233_v44 = vpack.c.bf16 %v2219_v61, %v2218_v3 }
 0x203   :  { %5449 = vmatpush3.bf16.msra.mxu1 %v6167_v34 }
 0x204   :  { %5450 = vmatprep.subr.bf16.mxu1 %v6168_v45 }
 0x206   :  { %5435 = vmatmul.mubr.bf16.gmra.mrb[28].mxu1 %v2037_v28 }
 0x207   :  { %5451 = vmatpush3.bf16.msra.mxu1 %v6168_v45  ;;  %5454 = vmatprep.mubr.bf16.mxu1 %v2232_v32  ;;  %v6211_v45 = vld [vmem:[#allocation6 + $0x108] sm:$0xff]  }
 0x208   :  { %5452 = vmatprep.subr.bf16.mxu1 %v6169_v54 }
 0x20b   :  { %5453 = vmatpush3.bf16.msra.mxu1 %v6169_v54  ;;  %v6187_v54 = vld [vmem:[#allocation6 + $0x8] sm:$0xff]  }
 0x20c   :  { %5470 = vmatprep.subr.bf16.mxu1 %v6170_v35 }
 0x20e   :  { %5455 = vmatmul.mubr.bf16.vlgmr.msra.gmra.mrb[16].mxu1 %v2233_v44 }
 0x20f   :  { %5458 = vmatprep.mubr.bf16.mxu1 %v2234_v56  ;;  %5471 = vmatpush3.bf16.msra.mxu1 %v6170_v35 }
 0x210   :  { %5472 = vmatprep.subr.bf16.mxu1 %v6171_v53 }
 0x213   :  { %5473 = vmatpush3.bf16.msra.mxu1 %v6171_v53 }
 0x214   :  { %5474 = vmatprep.subr.bf16.mxu1 %v6172_v40 }
 0x216   :  { %5459 = vmatmul.mubr.bf16.gmra.mrb[20].mxu1 %v2235_v42 }
 0x217   :  { %5462 = vmatprep.mubr.bf16.mxu1 %v2236_v39  ;;  %5475 = vmatpush3.bf16.msra.mxu1 %v6172_v40 }
 0x218   :  { %5476 = vmatprep.subr.bf16.mxu1 %v6173_v60 }
 0x21b   :  { %5477 = vmatpush3.bf16.msra.mxu1 %v6173_v60 }
 0x21c   :  { %5478 = vmatprep.subr.bf16.mxu1 %v6174_v46 }
 0x21e   :  { %5463 = vmatmul.mubr.bf16.gmra.mrb[24].mxu1 %v2237_v12 }
 0x21f   :  { %5466 = vmatprep.mubr.bf16.mxu1 %v2238_v62  ;;  %5479 = vmatpush3.bf16.msra.mxu1 %v6174_v46 }
 0x220   :  { %5480 = vmatprep.subr.bf16.mxu1 %v6175_v55 }
 0x223   :  { %5481 = vmatpush3.bf16.msra.mxu1 %v6175_v55 }
 0x224   :  { %5482 = vmatprep.subr.bf16.mxu1 %v6176_v36 }
 0x226   :  { %5467 = vmatmul.mubr.bf16.gmra.mrb[28].mxu1 %v2239_v20 }
 0x227   :  { %5483 = vmatpush3.bf16.msra.mxu1 %v6176_v36  ;;  %5486 = vmatprep.mubr.bf16.mxu1 %v6831_v23  ;;  %v6182_v23 = vld [vmem:[#allocation6 + $0x60] sm:$0xff]   ;;  %v6189_v36 = vld [vmem:[#allocation6 + $0x18] sm:$0xff]  }
 0x228   :  { %5484 = vmatprep.subr.bf16.mxu1 %v6177_v1  ;;  %5510 = vmatprep.subr.bf16.mxu0 %v6182_v23 }
 0x229   :  { %5511 = vmatpush3.bf16.msra.mxu0 %v6182_v23 }
 0x22a   :  { %5512 = vmatprep.subr.bf16.mxu0 %v6183_v24 }
 0x22b   :  { %5485 = vmatpush3.bf16.msra.mxu1 %v6177_v1 }
 0x22d   :  { %5513 = vmatpush3.bf16.msra.mxu0 %v6183_v24 }
 0x22e   :  { %5487 = vmatmul.mubr.bf16.vlgmr.msra.gmra.mrb[16].mxu1 %v6837_v27  ;;  %v6184_v27 = vld [vmem:[#allocation6 + $0x70] sm:$0xff]  }
 0x22f   :  { %5490 = vmatprep.mubr.bf16.mxu1 %v6849_v59  ;;  %v6185_v59 = vld [vmem:[#allocation6 + $0x78] sm:$0xff]   ;;  %5514 = vmatprep.subr.bf16.mxu0 %v6184_v27 }
 0x231   :  { %5515 = vmatpush3.bf16.msra.mxu0 %v6184_v27  ;;  %v2755_v27 = vld [vmem:[#allocation2 + $0xf8] sm:$0xff] }
 0x232   :  { %5516 = vmatprep.subr.bf16.mxu0 %v6185_v59 }
 0x235   :  { %5517 = vmatpush3.bf16.msra.mxu0 %v6185_v59 }
 0x236   :  { %5491 = vmatmul.mubr.bf16.gmra.mrb[20].mxu1 %v2437_v21 }
 0x237   :  { %5494 = vmatprep.mubr.bf16.mxu1 %v6861_v14  ;;  %v6186_v14 = vld [vmem:[#allocation6] sm:$0xff]  }
 0x238   :  { %5534 = vmatprep.subr.bf16.mxu0 %v6186_v14 }
 0x23e   :  { %5495 = vmatmul.mubr.bf16.gmra.mrb[24].mxu1 %v6867_v33 }
 0x23f   :  { %5498 = vmatprep.mubr.bf16.mxu1 %v6877_v13  ;;  %v6965_v13 = vld [vmem:[%s7322_s4] ss:$0 sm:$0xff] }
 0x246   :  { %5499 = vmatmul.mubr.bf16.gmra.mrb[28].mxu1 %v2441_v17  ;;  %v6203_v17 = vld [vmem:[#allocation6 + $0xc8] sm:$0xff]  }
 0x301   :  { %v5488_v33 = vpop.f32.mrb[16].mxu1 }
 0x302   :  { %v2629_v5 = vadd.f32 %v5488_v33, %v6965_v13  ;;  %v2541_v16 = vpop.f32.mrb[17].mxu1  ;;  %v6190_v33 = vld [vmem:[#allocation6 + $0x20] sm:$0xff]  }
 0x303   :  { %v2627_v37 = vadd.f32 %v6965_v13, %v2541_v16  ;;  %v5489_v47 = vpop.f32.mrb[18].mxu1 }
 0x304   :  { %vm2645_vm1 = vcmp.ge.f32.partialorder %v2629_v5, 0.0  ;;  %v2661_v19 = vmul.f32 0.01, %v2629_v5  ;;  %v2630_v50 = vadd.f32 %v5489_v47, %v6965_v13  ;;  %v2544_v49 = vpop.f32.mrb[19].mxu1 }
 0x305   :  { %vm2643_vm2 = vcmp.ge.f32.partialorder %v2627_v37, 0.0  ;;  %v2659_v6 = vmul.f32 0.01, %v2627_v37  ;;  %v2628_v41 = vadd.f32 %v6965_v13, %v2544_v49 }
 0x306   :  { %v6971_v22 = vsel %vm2645_vm1, %v2629_v5, %v2661_v19  ;;  %vm2646_vm3 = vcmp.ge.f32.partialorder %v2630_v50, 0.0  ;;  %v2662_v10 = vmul.f32 0.01, %v2630_v50 }
 0x307   :  { %2693 = vst [vmem:[#allocation2 + $0x50] sm:$0xff] %v6971_v22  ;;  %v6974_v25 = vsel %vm2643_vm2, %v2627_v37, %v2659_v6  ;;  %vm2644_vm4 = vcmp.ge.f32.partialorder %v2628_v41, 0.0  ;;  %v2660_v26 = vmul.f32 0.01, %v2628_v41 }
 0x308   :  { %2691 = vst [vmem:[#allocation2 + $0x20] sm:$0xff] %v6974_v25  ;;  %v6977_v0 = vsel %vm2646_vm3, %v2630_v50, %v2662_v10  ;;  %v2763_v30 = vpack.c.bf16 %v6974_v25, %v2747_v7 }
 0x309   :  { %2694 = vst [vmem:[#allocation2 + $0x68] sm:$0xff] %v6977_v0  ;;  %v6981_v31 = vsel %vm2644_vm4, %v2628_v41, %v2660_v26  ;;  %v5492_v34 = vpop.f32.mrb[20].mxu1  ;;  %v6191_v26 = vld [vmem:[#allocation6 + $0x28] sm:$0xff]  }
 0x30a   :  { %2692 = vst [vmem:[#allocation2 + $0x38] sm:$0xff] %v6981_v31  ;;  %v2633_v29 = vadd.f32 %v5492_v34, %v6965_v13  ;;  %v2557_v28 = vpop.f32.mrb[21].mxu1  ;;  %5518 = vmatprep.mubr.bf16.mxu0 %v2763_v30  ;;  %v2764_v57 = vpack.c.bf16 %v6971_v22, %v6981_v31 }
 0x30b   :  { %v2631_v35 = vadd.f32 %v6965_v13, %v2557_v28  ;;  %v5493_v61 = vpop.f32.mrb[22].mxu1  ;;  %v6207_v28 = vld [vmem:[#allocation6 + $0xe8] sm:$0xff]  }
 0x30c   :  { %vm2649_vm5 = vcmp.ge.f32.partialorder %v2633_v29, 0.0  ;;  %v2665_v38 = vmul.f32 0.01, %v2633_v29  ;;  %v2634_v3 = vadd.f32 %v5493_v61, %v6965_v13  ;;  %v2560_v44 = vpop.f32.mrb[23].mxu1  ;;  %5519 = vmatmul.mubr.bf16.vlgmr.msra.gmra.mrb[16].mxu0 %v2764_v57  ;;  %v6201_v61 = vld [vmem:[#allocation6 + $0xb8] sm:$0xff]  }
 0x30d   :  { %vm2647_vm6 = vcmp.ge.f32.partialorder %v2631_v35, 0.0  ;;  %v2663_v52 = vmul.f32 0.01, %v2631_v35  ;;  %v2632_v53 = vadd.f32 %v6965_v13, %v2560_v44  ;;  %5535 = vmatpush3.bf16.msra.mxu0 %v6186_v14 }
 0x30e   :  { %v6994_v56 = vsel %vm2649_vm5, %v2633_v29, %v2665_v38  ;;  %vm2650_vm7 = vcmp.ge.f32.partialorder %v2634_v3, 0.0  ;;  %v2666_v40 = vmul.f32 0.01, %v2634_v3  ;;  %5536 = vmatprep.subr.bf16.mxu0 %v6187_v54  ;;  %v7004_v60 = vld [vmem:[#allocation2 + $0x51] sm:$0xff] }
 0x30f   :  { %2697 = vst [vmem:[#allocation2 + $0xb0] sm:$0xff] %v6994_v56  ;;  %v6997_v63 = vsel %vm2647_vm6, %v2631_v35, %v2663_v52  ;;  %vm2648_vm8 = vcmp.ge.f32.partialorder %v2632_v53, 0.0  ;;  %v2664_v2 = vmul.f32 0.01, %v2632_v53  ;;  %v7022_v20 = vld [vmem:[#allocation2 + $0x21] sm:$0xff] }
 0x310   :  { %2695 = vst [vmem:[#allocation2 + $0x80] sm:$0xff] %v6997_v63  ;;  %v7000_v42 = vsel %vm2650_vm7, %v2634_v3, %v2666_v40  ;;  %v2765_v51 = vpack.c.bf16 %v6997_v63, %v6977_v0  ;;  %v7006_v39 = vld [vmem:[#allocation2 + $0x69] sm:$0xff] }
 0x311   :  { %2698 = vst [vmem:[#allocation2 + $0xc8] sm:$0xff] %v7000_v42  ;;  %v7009_v46 = vsel %vm2648_vm8, %v2632_v53, %v2664_v2  ;;  %v5496_v8 = vpop.f32.mrb[24].mxu1  ;;  %5537 = vmatpush3.bf16.msra.mxu0 %v6187_v54  ;;  %v7011_v18 = vld [vmem:[#allocation2 + $0x39] sm:$0xff]  ;;  %v6192_v53 = vld [vmem:[#allocation6 + $0x30] sm:$0xff]  }
 0x312   :  { %2696 = vst [vmem:[#allocation2 + $0x98] sm:$0xff] %v7009_v46  ;;  %v2637_v43 = vadd.f32 %v5496_v8, %v6965_v13  ;;  %v2573_v55 = vpop.f32.mrb[25].mxu1  ;;  %5522 = vmatprep.mubr.bf16.mxu0 %v2765_v51  ;;  %v2766_v62 = vpack.c.bf16 %v6994_v56, %v7009_v46  ;;  %5538 = vmatprep.subr.bf16.mxu0 %v6188_v58  ;;  %v7069_v51 = vld [vmem:[#allocation2 + $0x1f] sm:$0xff] }
 0x313   :  { %v2635_v48 = vadd.f32 %v6965_v13, %v2573_v55  ;;  %v5497_v15 = vpop.f32.mrb[26].mxu1 }
 0x314   :  { %vm2653_vm9 = vcmp.ge.f32.partialorder %v2637_v43, 0.0  ;;  %v2669_v9 = vmul.f32 0.01, %v2637_v43  ;;  %v2638_v21 = vadd.f32 %v5497_v15, %v6965_v13  ;;  %v2576_v11 = vpop.f32.mrb[27].mxu1  ;;  %5523 = vmatmul.mubr.bf16.gmra.mrb[20].mxu0 %v2766_v62 }
 0x315   :  { %vm2651_vm10 = vcmp.ge.f32.partialorder %v2635_v48, 0.0  ;;  %v2667_v23 = vmul.f32 0.01, %v2635_v48  ;;  %v2636_v24 = vadd.f32 %v6965_v13, %v2576_v11  ;;  %5539 = vmatpush3.bf16.msra.mxu0 %v6188_v58  ;;  %v7089_v11 = vld [vmem:[#allocation2 + $0x7] sm:$0xff] }
 0x316   :  { %v7030_v59 = vsel %vm2653_vm9, %v2637_v43, %v2669_v9  ;;  %vm2654_vm11 = vcmp.ge.f32.partialorder %v2638_v21, 0.0  ;;  %v2670_v14 = vmul.f32 0.01, %v2638_v21  ;;  %5540 = vmatprep.subr.bf16.mxu0 %v6189_v36  ;;  %v6193_v9 = vld [vmem:[#allocation6 + $0x38] sm:$0xff]  }
 0x317   :  { %2701 = vst [vmem:[#allocation2 + $0x140] sm:$0xff] %v7030_v59  ;;  %v7033_v5 = vsel %vm2651_vm10, %v2635_v48, %v2667_v23  ;;  %vm2652_vm12 = vcmp.ge.f32.partialorder %v2636_v24, 0.0  ;;  %v2668_v16 = vmul.f32 0.01, %v2636_v24  ;;  %v7051_v29 = vld [vmem:[#allocation2 + $0x81] sm:$0xff]  ;;  %v2723_v23 = vpack.c.bf16 %v7069_v51, %v7089_v11 }
 0x318   :  { %2699 = vst [vmem:[#allocation2 + $0x110] sm:$0xff] %v7033_v5  ;;  %v7036_v37 = vsel %vm2654_vm11, %v2638_v21, %v2670_v14  ;;  %v2767_v47 = vpack.c.bf16 %v7033_v5, %v2755_v27  ;;  %v6194_v14 = vld [vmem:[#allocation6 + $0x80] sm:$0xff]  }
 0x319   :  { %2702 = vst [vmem:[#allocation2 + $0x158] sm:$0xff] %v7036_v37  ;;  %v7040_v19 = vsel %vm2652_vm12, %v2636_v24, %v2668_v16  ;;  %v5500_v50 = vpop.f32.mrb[28].mxu1  ;;  %5541 = vmatpush3.bf16.msra.mxu0 %v6189_v36  ;;  %v7042_v49 = vld [vmem:[#allocation2 + $0x99] sm:$0xff]  ;;  %v7168_v36 = vpack.c.bf16 %v7051_v29, %v7006_v39 }
 0x31a   :  { %2700 = vst [vmem:[#allocation2 + $0x128] sm:$0xff] %v7040_v19  ;;  %v2641_v41 = vadd.f32 %v5500_v50, %v6965_v13  ;;  %v2589_v7 = vpop.f32.mrb[29].mxu1  ;;  %5526 = vmatprep.mubr.bf16.mxu0 %v2767_v47  ;;  %v2768_v10 = vpack.c.bf16 %v7030_v59, %v7040_v19  ;;  %5542 = vmatprep.subr.bf16.mxu0 %v6190_v33  ;;  %v7099_v16 = vld [vmem:[#allocation2 + $0x7f] sm:$0xff]  ;;  %v7101_v47 = vld [vmem:[#allocation2 + $0x4f] sm:$0xff] }
 0x31b   :  { %v2639_v30 = vadd.f32 %v6965_v13, %v2589_v7  ;;  %v5501_v34 = vpop.f32.mrb[30].mxu1  ;;  %v6205_v24 = vld [vmem:[#allocation6 + $0xd8] sm:$0xff]  }
 0x31c   :  { %vm2657_vm13 = vcmp.ge.f32.partialorder %v2641_v41, 0.0  ;;  %v2673_v57 = vmul.f32 0.01, %v2641_v41  ;;  %v2642_v54 = vadd.f32 %v5501_v34, %v6965_v13  ;;  %v2592_v35 = vpop.f32.mrb[31].mxu1  ;;  %5527 = vmatmul.mubr.bf16.gmra.mrb[24].mxu0 %v2768_v10  ;;  %v7111_v10 = vld [vmem:[#allocation2 + $0x67] sm:$0xff] }
 0x31d   :  { %vm2655_vm14 = vcmp.ge.f32.partialorder %v2639_v30, 0.0  ;;  %v2671_v38 = vmul.f32 0.01, %v2639_v30  ;;  %v2640_v3 = vadd.f32 %v6965_v13, %v2592_v35  ;;  %5543 = vmatpush3.bf16.msra.mxu0 %v6190_v33  ;;  %v7097_v33 = vld [vmem:[#allocation2 + $0x37] sm:$0xff]  ;;  %v7117_v34 = vpack.c.bf16 %v7099_v16, %v7111_v10 }
 0x31e   :  { %v7059_v44 = vsel %vm2657_vm13, %v2641_v41, %v2673_v57  ;;  %vm2658_vm15 = vcmp.ge.f32.partialorder %v2642_v54, 0.0  ;;  %v2674_v52 = vmul.f32 0.01, %v2642_v54  ;;  %5544 = vmatprep.subr.bf16.mxu0 %v6191_v26  ;;  %v7071_v8 = vld [vmem:[#allocation2 + $0x141] sm:$0xff]  ;;  %v7109_v7 = vpack.c.bf16 %v7101_v47, %v7097_v33  ;;  %v6196_v57 = vld [vmem:[#allocation6 + $0x90] sm:$0xff]  }
 0x31f   :  { %2705 = vst [vmem:[#allocation2 + $0x1a0] sm:$0xff] %v7059_v44  ;;  %v7062_v40 = vsel %vm2655_vm14, %v2639_v30, %v2671_v38  ;;  %vm2656_vm0 = vcmp.ge.f32.partialorder %v2640_v3, 0.0  ;;  %v2672_v58 = vmul.f32 0.01, %v2640_v3  ;;  %v7087_v21 = vld [vmem:[#allocation2 + $0x111] sm:$0xff]  ;;  %v3078_v30 = vld [vmem:[#allocation2 + $0x9] sm:$0xff]  ;;  %v3296_v1 = vpack.c.bf16 %v7097_v33, %v7069_v51 }
 0x320   :  { %2703 = vst [vmem:[#allocation2 + $0x170] sm:$0xff] %v7062_v40  ;;  %v7065_v2 = vsel %vm2658_vm15, %v2642_v54, %v2674_v52  ;;  %v2769_v13 = vpack.c.bf16 %v7062_v40, %v7036_v37  ;;  %v7073_v43 = vld [vmem:[#allocation2 + $0x159] sm:$0xff]  ;;  %v7123_v35 = vld [vmem:[#allocation2 + $0x10f] sm:$0xff]  ;;  %v3094_v12 = vpack.c.bf16 %v7022_v20, %v3078_v30  ;;  %v7203_v33 = vld [vmem:[#allocation2 + $0xc7] sm:$0xff] }
 0x321   :  { %2706 = vst [vmem:[#allocation2 + $0x1b8] sm:$0xff] %v7065_v2  ;;  %v7076_v55 = vsel %vm2656_vm0, %v2640_v3, %v2672_v58  ;;  %5545 = vmatpush3.bf16.msra.mxu0 %v6191_v26  ;;  %v7078_v62 = vld [vmem:[#allocation2 + $0x129] sm:$0xff]  ;;  %v7121_v54 = vld [vmem:[#allocation2 + $0x97] sm:$0xff]  ;;  %v6198_v58 = vld [vmem:[#allocation6 + $0xa0] sm:$0xff]  }
 0x322   :  { %2704 = vst [vmem:[#allocation2 + $0x188] sm:$0xff] %v7076_v55  ;;  %5530 = vmatprep.mubr.bf16.mxu0 %v2769_v13  ;;  %v2770_v15 = vpack.c.bf16 %v7059_v44, %v7076_v55  ;;  %5546 = vmatprep.subr.bf16.mxu0 %v6192_v53  ;;  %v6195_v26 = vld [vmem:[#allocation6 + $0x88] sm:$0xff]   ;;  %v6197_v52 = vld [vmem:[#allocation6 + $0x98] sm:$0xff]   ;;  %v3298_v32 = vpack.c.bf16 %v7121_v54, %v7099_v16  ;;  %v6212_v51 = vld [vmem:[#allocation6 + $0x110] sm:$0xff]  }
 0x323   :  { %v7125_v38 = vld [vmem:[#allocation2 + $0xaf] sm:$0xff]  ;;  %v7134_v13 = vld [vmem:[#allocation2 + $0x127] sm:$0xff]  ;;  %v3086_v30 = vld [vmem:[#allocation2 + $0xf9] sm:$0xff] }
 0x324   :  { %5531 = vmatmul.mubr.bf16.gmra.mrb[28].mxu0 %v2770_v15  ;;  %v7129_v3 = vpack.c.bf16 %v7125_v38, %v7121_v54  ;;  %v3098_v6 = vpack.c.bf16 %v7087_v21, %v3086_v30  ;;  %v6209_v30 = vld [vmem:[#allocation6 + $0xf8] sm:$0xff]   ;;  %v6214_v16 = vld [vmem:[#allocation6 + $0x120] sm:$0xff]   ;;  %v6216_v54 = vld [vmem:[#allocation6 + $0x130] sm:$0xff]  }
 0x325   :  { %5547 = vmatpush3.bf16.msra.mxu0 %v6192_v53  ;;  %5550 = vmatprep.mubr.bf16.mxu0 %v2723_v23  ;;  %v2727_v53 = vpack.c.bf16 %v7123_v35, %v7089_v11 }
 0x326   :  { %5548 = vmatprep.subr.bf16.mxu0 %v6193_v9  ;;  %v7154_v48 = vld [vmem:[#allocation2 + $0x19f] sm:$0xff] }
 0x327   :  { %v7103_v50 = vld [vmem:[#allocation2 + $0x171] sm:$0xff] }
 0x328   :  { %v7136_v15 = vld [vmem:[#allocation2 + $0x16f] sm:$0xff]  ;;  %v7186_v4 = vpack.c.bf16 %v7103_v50, %v7073_v43 }
 0x329   :  { %5549 = vmatpush3.bf16.msra.mxu0 %v6193_v9  ;;  %v7105_v41 = vld [vmem:[#allocation2 + $0x189] sm:$0xff]  ;;  %v7138_v9 = vld [vmem:[#allocation2 + $0x13f] sm:$0xff] }
 0x32a   :  { %5566 = vmatprep.subr.bf16.mxu0 %v6194_v14  ;;  %v7142_v23 = vpack.c.bf16 %v7138_v9, %v7134_v13 }
 0x32c   :  { %5551 = vmatmul.mubr.bf16.vlgmr.msra.gmra.mrb[16].mxu0 %v7109_v7 }
 0x32d   :  { %5554 = vmatprep.mubr.bf16.mxu0 %v7117_v34  ;;  %5567 = vmatpush3.bf16.msra.mxu0 %v6194_v14  ;;  %v7144_v14 = vld [vmem:[#allocation2 + $0x157] sm:$0xff] }
 0x32e   :  { %5568 = vmatprep.subr.bf16.mxu0 %v6195_v26 }
 0x331   :  { %5569 = vmatpush3.bf16.msra.mxu0 %v6195_v26  ;;  %v6199_v26 = vld [vmem:[#allocation6 + $0xa8] sm:$0xff]  }
 0x332   :  { %5570 = vmatprep.subr.bf16.mxu0 %v6196_v57 }
 0x334   :  { %5555 = vmatmul.mubr.bf16.gmra.mrb[20].mxu0 %v7129_v3 }
 0x335   :  { %5558 = vmatprep.mubr.bf16.mxu0 %v2727_v53  ;;  %5571 = vmatpush3.bf16.msra.mxu0 %v6196_v57  ;;  %v7148_v57 = vpack.c.bf16 %v7136_v15, %v7144_v14  ;;  %v7152_v53 = vld [vmem:[#allocation2 + $0x187] sm:$0xff] }
 0x336   :  { %5572 = vmatprep.subr.bf16.mxu0 %v6197_v52  ;;  %v7158_v27 = vpack.c.bf16 %v7154_v48, %v7152_v53 }
 0x339   :  { %5573 = vmatpush3.bf16.msra.mxu0 %v6197_v52  ;;  %v6200_v52 = vld [vmem:[#allocation6 + $0xb0] sm:$0xff]  }
 0x33a   :  { %5574 = vmatprep.subr.bf16.mxu0 %v6198_v58 }
 0x33c   :  { %5559 = vmatmul.mubr.bf16.gmra.mrb[24].mxu0 %v7142_v23 }
 0x33d   :  { %5562 = vmatprep.mubr.bf16.mxu0 %v7148_v57  ;;  %5575 = vmatpush3.bf16.msra.mxu0 %v6198_v58  ;;  %v6202_v58 = vld [vmem:[#allocation6 + $0xc0] sm:$0xff]  }
 0x33e   :  { %5576 = vmatprep.subr.bf16.mxu0 %v6199_v26 }
 0x341   :  { %5577 = vmatpush3.bf16.msra.mxu0 %v6199_v26  ;;  %v7164_v26 = vpack.c.bf16 %v7004_v60, %v7011_v18 }
 0x342   :  { %5578 = vmatprep.subr.bf16.mxu0 %v6200_v52 }
 0x344   :  { %5563 = vmatmul.mubr.bf16.gmra.mrb[28].mxu0 %v7158_v27 }
 0x345   :  { %5579 = vmatpush3.bf16.msra.mxu0 %v6200_v52  ;;  %5582 = vmatprep.mubr.bf16.mxu0 %v3094_v12  ;;  %v6204_v12 = vld [vmem:[#allocation6 + $0xd0] sm:$0xff]  }
 0x346   :  { %5580 = vmatprep.subr.bf16.mxu0 %v6201_v61 }
 0x349   :  { %5581 = vmatpush3.bf16.msra.mxu0 %v6201_v61  ;;  %v7172_v61 = vld [vmem:[#allocation2 + $0xb1] sm:$0xff] }
 0x34a   :  { %5598 = vmatprep.subr.bf16.mxu0 %v6202_v58  ;;  %v7176_v52 = vpack.c.bf16 %v7172_v61, %v7042_v49 }
 0x34c   :  { %5583 = vmatmul.mubr.bf16.vlgmr.msra.gmra.mrb[16].mxu0 %v7164_v26 }
 0x34d   :  { %5586 = vmatprep.mubr.bf16.mxu0 %v7168_v36  ;;  %5599 = vmatpush3.bf16.msra.mxu0 %v6202_v58  ;;  %v6206_v58 = vld [vmem:[#allocation6 + $0xe0] sm:$0xff]  }
 0x34e   :  { %5600 = vmatprep.subr.bf16.mxu0 %v6203_v17 }
 0x351   :  { %5601 = vmatpush3.bf16.msra.mxu0 %v6203_v17  ;;  %v7182_v17 = vpack.c.bf16 %v7071_v8, %v7078_v62 }
 0x352   :  { %5602 = vmatprep.subr.bf16.mxu0 %v6204_v12 }
 0x354   :  { %5587 = vmatmul.mubr.bf16.gmra.mrb[20].mxu0 %v7176_v52 }
 0x355   :  { %5590 = vmatprep.mubr.bf16.mxu0 %v3098_v6  ;;  %5603 = vmatpush3.bf16.msra.mxu0 %v6204_v12  ;;  %v6208_v6 = vld [vmem:[#allocation6 + $0xf0] sm:$0xff]   ;;  %v7190_v12 = vld [vmem:[#allocation2 + $0x1a1] sm:$0xff] }
 0x356   :  { %5604 = vmatprep.subr.bf16.mxu0 %v6205_v24 }
 0x359   :  { %5605 = vmatpush3.bf16.msra.mxu0 %v6205_v24  ;;  %v7194_v24 = vpack.c.bf16 %v7190_v12, %v7105_v41 }
 0x35a   :  { %5606 = vmatprep.subr.bf16.mxu0 %v6206_v58 }
 0x35c   :  { %5591 = vmatmul.mubr.bf16.gmra.mrb[24].mxu0 %v7182_v17 }
 0x35d   :  { %5594 = vmatprep.mubr.bf16.mxu0 %v7186_v4  ;;  %5607 = vmatpush3.bf16.msra.mxu0 %v6206_v58  ;;  %v6210_v58 = vld [vmem:[#allocation6 + $0x100] sm:$0xff]  }
 0x35e   :  { %5608 = vmatprep.subr.bf16.mxu0 %v6207_v28 }
 0x361   :  { %5609 = vmatpush3.bf16.msra.mxu0 %v6207_v28  ;;  %v3297_v28 = vpack.c.bf16 %v7111_v10, %v7101_v47  ;;  %v3300_v47 = vpack.c.bf16 %v7134_v13, %v7123_v35  ;;  %v6215_v10 = vld [vmem:[#allocation6 + $0x128] sm:$0xff]   ;;  %v7213_v35 = vld [vmem:[#allocation2 + $0x1b7] sm:$0xff] }
 0x362   :  { %5610 = vmatprep.subr.bf16.mxu0 %v6208_v6  ;;  %v6217_v13 = vld [vmem:[#allocation6 + $0x138] sm:$0xff]  }
 0x364   :  { %5595 = vmatmul.mubr.bf16.gmra.mrb[28].mxu0 %v7194_v24 }
 0x365   :  { %5611 = vmatpush3.bf16.msra.mxu0 %v6208_v6  ;;  %5614 = vmatprep.mubr.bf16.mxu0 %v3296_v1  ;;  %v3299_v1 = vpack.c.bf16 %v7203_v33, %v7125_v38  ;;  %v6213_v6 = vld [vmem:[#allocation6 + $0x118] sm:$0xff]   ;;  %v3303_v38 = vpack.c.bf16 %v7213_v35, %v7154_v48  ;;  %v7338_v48 = vpack.c.bf16 %v7009_v46, %v6997_v63 }
 0x366   :  { %5612 = vmatprep.subr.bf16.mxu0 %v6209_v30  ;;  %v7341_v63 = vpack.c.bf16 %v7036_v37, %v7030_v59  ;;  %v7342_v46 = vpack.c.bf16 %v7076_v55, %v7062_v40  ;;  %v6226_v59 = vld [vmem:[#allocation6 + $0x180] sm:$0xff]   ;;  %v6227_v37 = vld [vmem:[#allocation6 + $0x188] sm:$0xff]   ;;  %v7345_v40 = vpack.c.bf16 %v7006_v39, %v7004_v60  ;;  %v7346_v55 = vpack.c.bf16 %v7042_v49, %v7051_v29 }
 0x367   :  { %v7347_v60 = vpack.c.bf16 %v7078_v62, %v7087_v21  ;;  %v6230_v39 = vld [vmem:[#allocation6 + $0x1a0] sm:$0xff]   ;;  %v6231_v49 = vld [vmem:[#allocation6 + $0x1a8] sm:$0xff]   ;;  %v7348_v29 = vpack.c.bf16 %v7073_v43, %v7071_v8  ;;  %v6233_v21 = vld [vmem:[#allocation6 + $0x1b8] sm:$0xff]  }
 0x368   :  { %v6234_v8 = vld [vmem:[#allocation6 + $0x1c0] sm:$0xff]   ;;  %v6235_v43 = vld [vmem:[#allocation6 + $0x1c8] sm:$0xff]  }
 0x369   :  { %5613 = vmatpush3.bf16.msra.mxu0 %v6209_v30  ;;  %v6220_v30 = vld [vmem:[#allocation6 + $0x150] sm:$0xff]  }
 0x36a   :  { %5630 = vmatprep.subr.bf16.mxu0 %v6210_v58 }
 0x36c   :  { %5615 = vmatmul.mubr.bf16.vlgmr.msra.gmra.mrb[16].mxu0 %v3297_v28  ;;  %v6232_v28 = vld [vmem:[#allocation6 + $0x1b0] sm:$0xff]  }
 0x36d   :  { %5618 = vmatprep.mubr.bf16.mxu0 %v3298_v32  ;;  %5631 = vmatpush3.bf16.msra.mxu0 %v6210_v58  ;;  %v3301_v32 = vpack.c.bf16 %v7144_v14, %v7138_v9  ;;  %v7336_v9 = vpack.c.bf16 %v6981_v31, %v6974_v25  ;;  %v6219_v14 = vld [vmem:[#allocation6 + $0x148] sm:$0xff]   ;;  %v6221_v25 = vld [vmem:[#allocation6 + $0x158] sm:$0xff]   ;;  %v7339_v31 = vpack.c.bf16 %v7000_v42, %v6994_v56  ;;  %v6224_v56 = vld [vmem:[#allocation6 + $0x170] sm:$0xff]  }
 0x36e   :  { %5632 = vmatprep.subr.bf16.mxu0 %v6211_v45  ;;  %v7340_v58 = vpack.c.bf16 %v7040_v19, %v7033_v5  ;;  %v6225_v42 = vld [vmem:[#allocation6 + $0x178] sm:$0xff]   ;;  %v7343_v5 = vpack.c.bf16 %v7065_v2, %v7059_v44  ;;  %v7344_v19 = vpack.c.bf16 %v7011_v18, %v7022_v20  ;;  %v6228_v44 = vld [vmem:[#allocation6 + $0x190] sm:$0xff]  }
 0x36f   :  { %v7250_v2 = vld [vmem:[#allocation2 + $0xc9] sm:$0xff]  ;;  %v6229_v20 = vld [vmem:[#allocation6 + $0x198] sm:$0xff]  }
 0x370   :  { %v3703_v18 = vpack.c.bf16 %v7250_v2, %v7172_v61  ;;  %v7349_v61 = vpack.c.bf16 %v7105_v41, %v7103_v50  ;;  %v6236_v50 = vld [vmem:[#allocation6 + $0x1d0] sm:$0xff]   ;;  %v3905_v41 = vpack.c.bf16 %v7089_v11, %v7203_v33  ;;  %v3909_v33 = vpack.c.bf16 %v7089_v11, %v7213_v35  ;;  %v4094_v35 = vld [vmem:[#allocation2 + $0xc8] sm:$0xff] }
 0x371   :  { %5633 = vmatpush3.bf16.msra.mxu0 %v6211_v45  ;;  %v3302_v45 = vpack.c.bf16 %v7152_v53, %v7136_v15  ;;  %v6218_v15 = vld [vmem:[#allocation6 + $0x140] sm:$0xff]   ;;  %v7337_v53 = vpack.c.bf16 %v6977_v0, %v6971_v22  ;;  %v6223_v0 = vld [vmem:[#allocation6 + $0x168] sm:$0xff]   ;;  %v6244_v11 = vld [vmem:[#allocation6 + $0x210] sm:$0xff]  }
 0x372   :  { %5634 = vmatprep.subr.bf16.mxu0 %v6212_v51  ;;  %v6222_v22 = vld [vmem:[#allocation6 + $0x160] sm:$0xff]  }
 0x374   :  { %5619 = vmatmul.mubr.bf16.gmra.mrb[20].mxu0 %v3299_v1  ;;  %v4088_v1 = vld [vmem:[#allocation2 + $0x38] sm:$0xff] }
 0x375   :  { %5622 = vmatprep.mubr.bf16.mxu0 %v3300_v47  ;;  %5635 = vmatpush3.bf16.msra.mxu0 %v6212_v51  ;;  %v7263_v51 = vld [vmem:[#allocation2 + $0x1b9] sm:$0xff] }
 0x376   :  { %5636 = vmatprep.subr.bf16.mxu0 %v6213_v6  ;;  %v3707_v62 = vpack.c.bf16 %v7263_v51, %v7190_v12  ;;  %v6237_v12 = vld [vmem:[#allocation6 + $0x1d8] sm:$0xff]  }
 0x379   :  { %5637 = vmatpush3.bf16.msra.mxu0 %v6213_v6  ;;  %v6241_v6 = vld [vmem:[#allocation6 + $0x1f8] sm:$0xff]  }
 0x37a   :  { %5638 = vmatprep.subr.bf16.mxu0 %v6214_v16 }
 0x37c   :  { %5623 = vmatmul.mubr.bf16.gmra.mrb[24].mxu0 %v3301_v32  ;;  %v4092_v32 = vld [vmem:[#allocation2 + $0x98] sm:$0xff] }
 0x37d   :  { %5626 = vmatprep.mubr.bf16.mxu0 %v3302_v45  ;;  %5639 = vmatpush3.bf16.msra.mxu0 %v6214_v16  ;;  %v6242_v16 = vld [vmem:[#allocation6 + $0x200] sm:$0xff]   ;;  %v4093_v45 = vld [vmem:[#allocation2 + $0xb0] sm:$0xff] }
 0x37e   :  { %5640 = vmatprep.subr.bf16.mxu0 %v6215_v10 }
 0x381   :  { %5641 = vmatpush3.bf16.msra.mxu0 %v6215_v10 }
 0x382   :  { %5642 = vmatprep.subr.bf16.mxu0 %v6216_v54 }
 0x384   :  { %5627 = vmatmul.mubr.bf16.gmra.mrb[28].mxu0 %v3303_v38  ;;  %v4106_v38 = vpack.c.bf16 %v4093_v45, %v4092_v32 }
 0x385   :  { %5643 = vmatpush3.bf16.msra.mxu0 %v6216_v54  ;;  %5646 = vmatprep.mubr.bf16.mxu0 %v7336_v9  ;;  %v6243_v54 = vld [vmem:[#allocation6 + $0x208] sm:$0xff]  }
 0x386   :  { %5644 = vmatprep.subr.bf16.mxu0 %v6217_v13  ;;  %v4096_v9 = vld [vmem:[#allocation2 + $0x128] sm:$0xff] }
 0x389   :  { %5645 = vmatpush3.bf16.msra.mxu0 %v6217_v13  ;;  %v4095_v13 = vld [vmem:[#allocation2 + $0xe0] sm:$0xff] }
 0x38a   :  { %5662 = vmatprep.subr.bf16.mxu0 %v6218_v15 }
 0x38c   :  { %5647 = vmatmul.mubr.bf16.vlgmr.msra.gmra.mrb[16].mxu0 %v7337_v53  ;;  %v6245_v53 = vld [vmem:[#allocation6 + $0x218] sm:$0xff]  }
 0x38d   :  { %5650 = vmatprep.mubr.bf16.mxu0 %v7338_v48  ;;  %5663 = vmatpush3.bf16.msra.mxu0 %v6218_v15  ;;  %v4107_v15 = vpack.c.bf16 %v4095_v13, %v4094_v35 }
 0x38e   :  { %5664 = vmatprep.subr.bf16.mxu0 %v6219_v14 }
 0x391   :  { %5665 = vmatpush3.bf16.msra.mxu0 %v6219_v14  ;;  %v4097_v14 = vld [vmem:[#allocation2 + $0x140] sm:$0xff] }
 0x392   :  { %5666 = vmatprep.subr.bf16.mxu0 %v6220_v30  ;;  %v4108_v48 = vpack.c.bf16 %v4097_v14, %v4096_v9 }
 0x394   :  { %5651 = vmatmul.mubr.bf16.gmra.mrb[20].mxu0 %v7339_v31  ;;  %v4100_v31 = vld [vmem:[#allocation2 + $0x188] sm:$0xff] }
 0x395   :  { %5654 = vmatprep.mubr.bf16.mxu0 %v7340_v58  ;;  %5667 = vmatpush3.bf16.msra.mxu0 %v6220_v30  ;;  %v6246_v30 = vld [vmem:[#allocation6 + $0x220] sm:$0xff]   ;;  %v4098_v58 = vld [vmem:[#allocation2 + $0x158] sm:$0xff] }
 0x396   :  { %5668 = vmatprep.subr.bf16.mxu0 %v6221_v25 }
 0x399   :  { %5669 = vmatpush3.bf16.msra.mxu0 %v6221_v25  ;;  %v4099_v25 = vld [vmem:[#allocation2 + $0x170] sm:$0xff] }
 0x39a   :  { %5670 = vmatprep.subr.bf16.mxu0 %v6222_v22 }
 0x39c   :  { %5655 = vmatmul.mubr.bf16.gmra.mrb[24].mxu0 %v7341_v63  ;;  %v6247_v63 = vld [vmem:[#allocation6 + $0x228] sm:$0xff]  }
 0x39d   :  { %5658 = vmatprep.mubr.bf16.mxu0 %v7342_v46  ;;  %5671 = vmatpush3.bf16.msra.mxu0 %v6222_v22  ;;  %v4109_v22 = vpack.c.bf16 %v4099_v25, %v4098_v58 }
 0x39e   :  { %5672 = vmatprep.subr.bf16.mxu0 %v6223_v0 }
 0x3a1   :  { %5673 = vmatpush3.bf16.msra.mxu0 %v6223_v0  ;;  %v4101_v0 = vld [vmem:[#allocation2 + $0x1a0] sm:$0xff] }
 0x3a2   :  { %5674 = vmatprep.subr.bf16.mxu0 %v6224_v56  ;;  %v4110_v46 = vpack.c.bf16 %v4101_v0, %v4100_v31 }
 0x3a4   :  { %5659 = vmatmul.mubr.bf16.gmra.mrb[28].mxu0 %v7343_v5  ;;  %v4103_v5 = vld [vmem:[#allocation2 + $0x1d0] sm:$0xff] }
 0x3a5   :  { %5675 = vmatpush3.bf16.msra.mxu0 %v6224_v56  ;;  %5678 = vmatprep.mubr.bf16.mxu0 %v7344_v19  ;;  %v6248_v56 = vld [vmem:[#allocation6 + $0x230] sm:$0xff]  }
 0x3a6   :  { %5676 = vmatprep.subr.bf16.mxu0 %v6225_v42 }
 0x3a9   :  { %5677 = vmatpush3.bf16.msra.mxu0 %v6225_v42  ;;  %v4102_v42 = vld [vmem:[#allocation2 + $0x1b8] sm:$0xff] }
 0x3aa   :  { %5694 = vmatprep.subr.bf16.mxu0 %v6226_v59  ;;  %v4111_v19 = vpack.c.bf16 %v4103_v5, %v4102_v42 }
 0x3ac   :  { %5679 = vmatmul.mubr.bf16.vlgmr.msra.gmra.mrb[16].mxu0 %v7345_v40 }
 0x3ad   :  { %5682 = vmatprep.mubr.bf16.mxu0 %v7346_v55  ;;  %5695 = vmatpush3.bf16.msra.mxu0 %v6226_v59  ;;  %v6249_v59 = vld [vmem:[#allocation6 + $0x238] sm:$0xff]  }
 0x3ae   :  { %5696 = vmatprep.subr.bf16.mxu0 %v6227_v37  ;;  %v4305_v55 = vld [vmem:[#allocation2 + $0x1d1] sm:$0xff] }
 0x3b1   :  { %5697 = vmatpush3.bf16.msra.mxu0 %v6227_v37  ;;  %v4297_v37 = vld [vmem:[#allocation2 + $0xe1] sm:$0xff] }
 0x3b2   :  { %5698 = vmatprep.subr.bf16.mxu0 %v6228_v44  ;;  %v4309_v40 = vpack.c.bf16 %v4297_v37, %v7250_v2 }
 0x3b4   :  { %5683 = vmatmul.mubr.bf16.gmra.mrb[20].mxu0 %v3703_v18 }
 0x3b5   :  { %5686 = vmatprep.mubr.bf16.mxu0 %v7347_v60  ;;  %5699 = vmatpush3.bf16.msra.mxu0 %v6228_v44  ;;  %v4313_v44 = vpack.c.bf16 %v4305_v55, %v7263_v51 }
 0x3b6   :  { %5700 = vmatprep.subr.bf16.mxu0 %v6229_v20 }
 0x3b9   :  { %5701 = vmatpush3.bf16.msra.mxu0 %v6229_v20 }
 0x3ba   :  { %5702 = vmatprep.subr.bf16.mxu0 %v6230_v39 }
 0x3bc   :  { %5687 = vmatmul.mubr.bf16.gmra.mrb[24].mxu0 %v7348_v29 }
 0x3bd   :  { %5690 = vmatprep.mubr.bf16.mxu0 %v7349_v61  ;;  %5703 = vmatpush3.bf16.msra.mxu0 %v6230_v39 }
 0x3be   :  { %5704 = vmatprep.subr.bf16.mxu0 %v6231_v49 }
 0x3c1   :  { %5705 = vmatpush3.bf16.msra.mxu0 %v6231_v49 }
 0x3c2   :  { %5706 = vmatprep.subr.bf16.mxu0 %v6232_v28 }
 0x3c4   :  { %5691 = vmatmul.mubr.bf16.gmra.mrb[28].mxu0 %v3707_v62 }
 0x3c5   :  { %5707 = vmatpush3.bf16.msra.mxu0 %v6232_v28  ;;  %5710 = vmatprep.mubr.bf16.mxu0 %v7109_v7  ;;  %v6238_v7 = vld [vmem:[#allocation6 + $0x1e0] sm:$0xff]  }
 0x3c6   :  { %5708 = vmatprep.subr.bf16.mxu0 %v6233_v21 }
 0x3c9   :  { %5709 = vmatpush3.bf16.msra.mxu0 %v6233_v21 }
 0x3ca   :  { %5726 = vmatprep.subr.bf16.mxu0 %v6234_v8 }
 0x3cc   :  { %5711 = vmatmul.mubr.bf16.vlgmr.msra.gmra.mrb[16].mxu0 %v7117_v34  ;;  %v6239_v34 = vld [vmem:[#allocation6 + $0x1e8] sm:$0xff]  }
 0x3cd   :  { %5714 = vmatprep.mubr.bf16.mxu0 %v7129_v3  ;;  %5727 = vmatpush3.bf16.msra.mxu0 %v6234_v8  ;;  %v6240_v3 = vld [vmem:[#allocation6 + $0x1f0] sm:$0xff]  }
 0x3ce   :  { %5728 = vmatprep.subr.bf16.mxu0 %v6235_v43 }
 0x3d1   :  { %5729 = vmatpush3.bf16.msra.mxu0 %v6235_v43 }
 0x3d2   :  { %5730 = vmatprep.subr.bf16.mxu0 %v6236_v50 }
 0x3d4   :  { %5715 = vmatmul.mubr.bf16.gmra.mrb[20].mxu0 %v3905_v41 }
 0x3d5   :  { %5718 = vmatprep.mubr.bf16.mxu0 %v7142_v23  ;;  %5731 = vmatpush3.bf16.msra.mxu0 %v6236_v50  ;;  %v4089_v23 = vld [vmem:[#allocation2 + $0x50] sm:$0xff] }
 0x3d6   :  { %5732 = vmatprep.subr.bf16.mxu0 %v6237_v12  ;;  %v4104_v47 = vpack.c.bf16 %v4089_v23, %v4088_v1 }
 0x3d9   :  { %5733 = vmatpush3.bf16.msra.mxu0 %v6237_v12 }
 0x3da   :  { %5734 = vmatprep.subr.bf16.mxu0 %v6238_v7 }
 0x3dc   :  { %5719 = vmatmul.mubr.bf16.gmra.mrb[24].mxu0 %v7148_v57  ;;  %v4091_v57 = vld [vmem:[#allocation2 + $0x80] sm:$0xff] }
 0x3dd   :  { %5722 = vmatprep.mubr.bf16.mxu0 %v7158_v27  ;;  %5735 = vmatpush3.bf16.msra.mxu0 %v6238_v7  ;;  %v4090_v27 = vld [vmem:[#allocation2 + $0x68] sm:$0xff] }
 0x3de   :  { %5736 = vmatprep.subr.bf16.mxu0 %v6239_v34  ;;  %v4105_v10 = vpack.c.bf16 %v4091_v57, %v4090_v27 }
 0x3e1   :  { %5737 = vmatpush3.bf16.msra.mxu0 %v6239_v34 }
 0x3e2   :  { %5738 = vmatprep.subr.bf16.mxu0 %v6240_v3 }
 0x3e4   :  { %5723 = vmatmul.mubr.bf16.gmra.mrb[28].mxu0 %v3909_v33 }
 0x3e5   :  { %5739 = vmatpush3.bf16.msra.mxu0 %v6240_v3  ;;  %5742 = vmatprep.mubr.bf16.mxu0 %v4104_v47 }
 0x3e6   :  { %5740 = vmatprep.subr.bf16.mxu0 %v6241_v6 }
 0x3e9   :  { %5741 = vmatpush3.bf16.msra.mxu0 %v6241_v6 }
 0x3ea   :  { %5758 = vmatprep.subr.bf16.mxu0 %v6242_v16 }
 0x3ec   :  { %5743 = vmatmul.mubr.bf16.vlgmr.msra.gmra.mrb[16].mxu0 %v4105_v10 }
 0x3ed   :  { %5746 = vmatprep.mubr.bf16.mxu0 %v4106_v38  ;;  %5759 = vmatpush3.bf16.msra.mxu0 %v6242_v16 }
 0x3ee   :  { %5760 = vmatprep.subr.bf16.mxu0 %v6243_v54 }
 0x3f1   :  { %5761 = vmatpush3.bf16.msra.mxu0 %v6243_v54 }
 0x3f2   :  { %5762 = vmatprep.subr.bf16.mxu0 %v6244_v11 }
 0x3f4   :  { %5747 = vmatmul.mubr.bf16.gmra.mrb[20].mxu0 %v4107_v15 }
 0x3f5   :  { %5750 = vmatprep.mubr.bf16.mxu0 %v4108_v48  ;;  %5763 = vmatpush3.bf16.msra.mxu0 %v6244_v11 }
 0x3f6   :  { %5764 = vmatprep.subr.bf16.mxu0 %v6245_v53 }
 0x3f9   :  { %5765 = vmatpush3.bf16.msra.mxu0 %v6245_v53 }
 0x3fa   :  { %5766 = vmatprep.subr.bf16.mxu0 %v6246_v30 }
 0x3fc   :  { %5751 = vmatmul.mubr.bf16.gmra.mrb[24].mxu0 %v4109_v22 }
 0x3fd   :  { %5754 = vmatprep.mubr.bf16.mxu0 %v4110_v46  ;;  %5767 = vmatpush3.bf16.msra.mxu0 %v6246_v30 }
 0x3fe   :  { %5768 = vmatprep.subr.bf16.mxu0 %v6247_v63 }
 0x401   :  { %5769 = vmatpush3.bf16.msra.mxu0 %v6247_v63 }
 0x402   :  { %5770 = vmatprep.subr.bf16.mxu0 %v6248_v56 }
 0x404   :  { %5755 = vmatmul.mubr.bf16.gmra.mrb[28].mxu0 %v4111_v19 }
 0x405   :  { %5771 = vmatpush3.bf16.msra.mxu0 %v6248_v56  ;;  %5774 = vmatprep.mubr.bf16.mxu0 %v7164_v26 }
 0x406   :  { %5772 = vmatprep.subr.bf16.mxu0 %v6249_v59 }
 0x409   :  { %5773 = vmatpush3.bf16.msra.mxu0 %v6249_v59 }
 0x40c   :  { %5775 = vmatmul.mubr.bf16.vlgmr.msra.gmra.mrb[16].mxu0 %v7168_v36  ;;  %v7288_v36 = vld [vmem:[%s7324_s6] ss:$0 sm:$0xff]  ;;  %s6328_s6 = smov [#allocation8]  }
 0x40d   :  { %5778 = vmatprep.mubr.bf16.mxu0 %v7176_v52  ;;  %s4584_s9 = sshll.u32 %s6328_s6, 4  ;;  %s4585_s9 = int_to_ptr.vmem [resolvable:$true] %s4584_s9 }
 0x40e   :  { %s6295_s1 = scalar_lea.vmem %s4585_s9, 2048  ;;  %p6300_p3 = scmp.lt.s32.totalorder %s4585_s9, %s4585_s9 }
 0x40f   :  { %p6296_p2 = scmp.ne.s32.totalorder %s4585_s9, %s6295_s1  ;;  %p6301_p4 = scmp.lt.s32.totalorder %s6295_s1, %s6295_s1 }
 0x411   :  { %p6302_p5 = por %p6301_p4, %p6300_p3 }
 0x413   :  { %p6303_p6 = pnand %p6302_p5, %p6296_p2 }
 0x414   :  { %5779 = vmatmul.mubr.bf16.gmra.mrb[20].mxu0 %v4309_v40 }
 0x415   :  { %5782 = vmatprep.mubr.bf16.mxu0 %v7182_v17 }
 0x41c   :  { %5783 = vmatmul.mubr.bf16.gmra.mrb[24].mxu0 %v7186_v4 }
 0x41d   :  { %5786 = vmatprep.mubr.bf16.mxu0 %v7194_v24 }
 0x424   :  { %5787 = vmatmul.mubr.bf16.gmra.mrb[28].mxu0 %v4313_v44 }
 0x4df   :  { %v5776_v26 = vpop.f32.mrb[16].mxu0 }
 0x4e0   :  { %v4501_v52 = vadd.f32 %v5776_v26, %v7288_v36  ;;  %v4413_v2 = vpop.f32.mrb[17].mxu0 }
 0x4e1   :  { %v4499_v18 = vadd.f32 %v7288_v36, %v4413_v2  ;;  %v5777_v17 = vpop.f32.mrb[18].mxu0 }
 0x4e2   :  { %vm4517_vm1 = vcmp.ge.f32.partialorder %v4501_v52, 0.0  ;;  %v4533_v4 = vmul.f32 0.01, %v4501_v52  ;;  %v4502_v24 = vadd.f32 %v5777_v17, %v7288_v36  ;;  %v4416_v20 = vpop.f32.mrb[19].mxu0 }
 0x4e3   :  { %vm4515_vm2 = vcmp.ge.f32.partialorder %v4499_v18, 0.0  ;;  %v4531_v60 = vmul.f32 0.01, %v4499_v18  ;;  %v4500_v39 = vadd.f32 %v7288_v36, %v4416_v20 }
 0x4e4   :  { %v4549_v49 = vsel %vm4517_vm1, %v4501_v52, %v4533_v4  ;;  %vm4518_vm3 = vcmp.ge.f32.partialorder %v4502_v24, 0.0  ;;  %v4534_v29 = vmul.f32 0.01, %v4502_v24 }
 0x4e5   :  { %4565 = vst [vmem:[#allocation8 + $0x10] sm:$0xff] %v4549_v49  ;;  %v4547_v61 = vsel %vm4515_vm2, %v4499_v18, %v4531_v60  ;;  %vm4516_vm4 = vcmp.ge.f32.partialorder %v4500_v39, 0.0  ;;  %v4532_v28 = vmul.f32 0.01, %v4500_v39 }
 0x4e6   :  { %4563 = vst [vmem:[#allocation8] sm:$0xff] %v4547_v61  ;;  %v4550_v51 = vsel %vm4518_vm3, %v4502_v24, %v4534_v29 }
 0x4e7   :  { %4566 = vst [vmem:[#allocation8 + $0x18] sm:$0xff] %v4550_v51  ;;  %v4548_v62 = vsel %vm4516_vm4, %v4500_v39, %v4532_v28  ;;  %v5780_v21 = vpop.f32.mrb[20].mxu0 }
 0x4e8   :  { %4564 = vst [vmem:[#allocation8 + $0x8] sm:$0xff] %v4548_v62  ;;  %v4505_v8 = vadd.f32 %v5780_v21, %v7288_v36  ;;  %v4429_v43 = vpop.f32.mrb[21].mxu0 }
 0x4e9   :  { %v4503_v50 = vadd.f32 %v7288_v36, %v4429_v43  ;;  %v5781_v41 = vpop.f32.mrb[22].mxu0 }
 0x4ea   :  { %vm4521_vm5 = vcmp.ge.f32.partialorder %v4505_v8, 0.0  ;;  %v4537_v12 = vmul.f32 0.01, %v4505_v8  ;;  %v4506_v7 = vadd.f32 %v5781_v41, %v7288_v36  ;;  %v4432_v34 = vpop.f32.mrb[23].mxu0 }
 0x4eb   :  { %vm4519_vm6 = vcmp.ge.f32.partialorder %v4503_v50, 0.0  ;;  %v4535_v3 = vmul.f32 0.01, %v4503_v50  ;;  %v4504_v1 = vadd.f32 %v7288_v36, %v4432_v34 }
 0x4ec   :  { %v4553_v33 = vsel %vm4521_vm5, %v4505_v8, %v4537_v12  ;;  %vm4522_vm7 = vcmp.ge.f32.partialorder %v4506_v7, 0.0  ;;  %v4538_v23 = vmul.f32 0.01, %v4506_v7 }
 0x4ed   :  { %4569 = vst [vmem:[#allocation8 + $0x30] sm:$0xff] %v4553_v33  ;;  %v4551_v6 = vsel %vm4519_vm6, %v4503_v50, %v4535_v3  ;;  %vm4520_vm8 = vcmp.ge.f32.partialorder %v4504_v1, 0.0  ;;  %v4536_v47 = vmul.f32 0.01, %v4504_v1 }
 0x4ee   :  { %4567 = vst [vmem:[#allocation8 + $0x20] sm:$0xff] %v4551_v6  ;;  %v4554_v16 = vsel %vm4522_vm7, %v4506_v7, %v4538_v23 }
 0x4ef   :  { %4570 = vst [vmem:[#allocation8 + $0x38] sm:$0xff] %v4554_v16  ;;  %v4552_v57 = vsel %vm4520_vm8, %v4504_v1, %v4536_v47  ;;  %v5784_v32 = vpop.f32.mrb[24].mxu0 }
 0x4f0   :  { %4568 = vst [vmem:[#allocation8 + $0x28] sm:$0xff] %v4552_v57  ;;  %v4509_v27 = vadd.f32 %v5784_v32, %v7288_v36  ;;  %v4445_v10 = vpop.f32.mrb[25].mxu0 }
 0x4f1   :  { %v4507_v45 = vadd.f32 %v7288_v36, %v4445_v10  ;;  %v5785_v54 = vpop.f32.mrb[26].mxu0 }
 0x4f2   :  { %vm4525_vm9 = vcmp.ge.f32.partialorder %v4509_v27, 0.0  ;;  %v4541_v38 = vmul.f32 0.01, %v4509_v27  ;;  %v4510_v11 = vadd.f32 %v5785_v54, %v7288_v36  ;;  %v4448_v35 = vpop.f32.mrb[27].mxu0 }
 0x4f3   :  { %vm4523_vm10 = vcmp.ge.f32.partialorder %v4507_v45, 0.0  ;;  %v4539_v13 = vmul.f32 0.01, %v4507_v45  ;;  %v4508_v9 = vadd.f32 %v7288_v36, %v4448_v35 }
 0x4f4   :  { %v4557_v15 = vsel %vm4525_vm9, %v4509_v27, %v4541_v38  ;;  %vm4526_vm11 = vcmp.ge.f32.partialorder %v4510_v11, 0.0  ;;  %v4542_v14 = vmul.f32 0.01, %v4510_v11 }
 0x4f5   :  { %4573 = vst [vmem:[#allocation8 + $0x50] sm:$0xff] %v4557_v15  ;;  %v4555_v53 = vsel %vm4523_vm10, %v4507_v45, %v4539_v13  ;;  %vm4524_vm12 = vcmp.ge.f32.partialorder %v4508_v9, 0.0  ;;  %v4540_v48 = vmul.f32 0.01, %v4508_v9 }
 0x4f6   :  { %4571 = vst [vmem:[#allocation8 + $0x40] sm:$0xff] %v4555_v53  ;;  %v4558_v30 = vsel %vm4526_vm11, %v4510_v11, %v4542_v14 }
 0x4f7   :  { %4574 = vst [vmem:[#allocation8 + $0x58] sm:$0xff] %v4558_v30  ;;  %v4556_v25 = vsel %vm4524_vm12, %v4508_v9, %v4540_v48  ;;  %v5788_v31 = vpop.f32.mrb[28].mxu0 }
 0x4f8   :  { %4572 = vst [vmem:[#allocation8 + $0x48] sm:$0xff] %v4556_v25  ;;  %v4513_v58 = vadd.f32 %v5788_v31, %v7288_v36  ;;  %v4461_v22 = vpop.f32.mrb[29].mxu0 }
 0x4f9   :  { %v4511_v0 = vadd.f32 %v7288_v36, %v4461_v22  ;;  %v5789_v63 = vpop.f32.mrb[30].mxu0 }
 0x4fa   :  { %vm4529_vm13 = vcmp.ge.f32.partialorder %v4513_v58, 0.0  ;;  %v4545_v46 = vmul.f32 0.01, %v4513_v58  ;;  %v4514_v56 = vadd.f32 %v5789_v63, %v7288_v36  ;;  %v4464_v42 = vpop.f32.mrb[31].mxu0 }
 0x4fb   :  { %vm4527_vm14 = vcmp.ge.f32.partialorder %v4511_v0, 0.0  ;;  %v4543_v5 = vmul.f32 0.01, %v4511_v0  ;;  %v4512_v19 = vadd.f32 %v7288_v36, %v4464_v42 }
 0x4fc   :  { %v4561_v59 = vsel %vm4529_vm13, %v4513_v58, %v4545_v46  ;;  %vm4530_vm15 = vcmp.ge.f32.partialorder %v4514_v56, 0.0  ;;  %v4546_v37 = vmul.f32 0.01, %v4514_v56 }
 0x4fd   :  { %4577 = vst [vmem:[#allocation8 + $0x70] sm:$0xff] %v4561_v59  ;;  %v4559_v40 = vsel %vm4527_vm14, %v4511_v0, %v4543_v5  ;;  %vm4528_vm0 = vcmp.ge.f32.partialorder %v4512_v19, 0.0  ;;  %v4544_v55 = vmul.f32 0.01, %v4512_v19 }
 0x4fe   :  { %4575 = vst [vmem:[#allocation8 + $0x60] sm:$0xff] %v4559_v40  ;;  %v4562_v44 = vsel %vm4530_vm15, %v4514_v56, %v4546_v37 }
 0x4ff   :  { %4578 = vst [vmem:[#allocation8 + $0x78] sm:$0xff] %v4562_v44  ;;  %v4560_v26 = vsel %vm4528_vm0, %v4512_v19, %v4544_v55 }
 0x500   :  { %4576 = vst [vmem:[#allocation8 + $0x68] sm:$0xff] %v4560_v26 }
 0x501   :  { %6306 = shalt.err (!%p6303_p6)
}
 0x502   :  { %s6307_s11 = scalar_lea.hbm %s7325_s7, 2048 }
 0x503   :  { %p6308_p7 = scmp.ne.s32.totalorder %s7325_s7, %s6307_s11  ;;  %p6311_p8 = scmp.lt.u32.totalorder %s6307_s11, %s7325_s7 }
 0x505   :  { %p6313_p9 = pnand %p6311_p8, %p6308_p7 }
 0x507   :  { %6316 = shalt.err (!%p6313_p9)
}
 0x508   :  { %s6329_s16 = smov 128   ;;  %s6330_s17 = smov 8  }
 0x509   :  { %4590 = dma.vmem_to_hbm [thread:$0]  %s4585_s9, 2048, %s7325_s7, [#allocation5], %s6329_s16, %s6329_s16, %s6330_s17  }
 0x50a   :  { %6321 = dma.done.wait [#allocation5], 2048  }
 0x50b   :  { %6322 = vsyncadd [#allocation5], 4294965248 }
 0x50c   :  { %4594 = vsyncpa [#allocation4], 1 }
 0x50d   :  { %4595 = vsyncpa [#allocation7], 1 }
 0x50e   :  { %4596 = vsyncpa [#allocation5], 1 }

</bundles_post_ra>
